<compile_context>
chip_gen: v5e
topology: v5e:2x2
jax: 0.10.0
libtpu: 0.0.40
codegen_flags: <defaults>
</compile_context>

<pallas_src>
import functools

import jax
import jax.numpy as jnp
from jax.experimental import pallas as pl
from jax.experimental.pallas import tpu as pltpu


LEAKY_SLOPE = 0.01   # F.leaky_relu default negative_slope
LN_EPS = 1e-5        # nn.LayerNorm default eps
H1, H2 = 400, 300    # hidden sizes from the module definition
H1P = 512            # lane-aligned (4*128) padded width of the first hidden layer


def _leaky_relu(h):
    return jnp.where(h > 0, h, LEAKY_SLOPE * h)


def _layer_norm(h, gamma, beta, n_valid):
    # One-pass statistics (sum & sum-of-squares); `n_valid` is the true feature
    # count, zero-padded lanes contribute exactly 0 to both sums.  Variance is
    # clamped at 0 to guard against cancellation-induced negatives.
    inv_n = 1.0 / float(n_valid)
    s = jnp.sum(h, axis=-1, keepdims=True)
    s2 = jnp.sum(h * h, axis=-1, keepdims=True)
    mean = s * inv_n
    var = jnp.maximum(s2 * inv_n - mean * mean, 0.0)
    inv = jax.lax.rsqrt(var + LN_EPS)
    return (h - mean) * inv * gamma + beta


def _critic_kernel(layer_norm, xu_ref, w1_ref, vec1_ref, w2_ref, w5_ref,
                   vec2_ref, w36_ref, q_ref):
    xu = xu_ref[...].astype(jnp.bfloat16)

    # ---- fused twin layer 1 (single bf16 MXU dot): [h1_q1 | h1_q2] -> (tb, 2*H1P)
    # Padded lanes (400:512 of each half) are exactly 0 (zero-padded W and b).
    h1 = (jnp.dot(xu, w1_ref[...], preferred_element_type=jnp.float32)
          + vec1_ref[0:1, :])
    h1a = h1[:, :H1P]          # 128-lane aligned splits (512 = 4 * 128)
    h1b = h1[:, H1P:]
    if layer_norm:
        h1a = _layer_norm(h1a, vec1_ref[1:2, :H1P], vec1_ref[2:3, :H1P], H1)
        h1b = _layer_norm(h1b, vec1_ref[1:2, H1P:], vec1_ref[2:3, H1P:], H1)
    h1a = _leaky_relu(h1a).astype(jnp.bfloat16)
    h1b = _leaky_relu(h1b).astype(jnp.bfloat16)

    # ---- layer 2 (per head; contraction dim zero-padded 400 -> 512, bf16 MXU) ----
    h2a = jnp.dot(h1a, w2_ref[...], preferred_element_type=jnp.float32) + vec2_ref[0:1, :]
    h2b = jnp.dot(h1b, w5_ref[...], preferred_element_type=jnp.float32) + vec2_ref[1:2, :]
    if layer_norm:
        h2a = _layer_norm(h2a, vec2_ref[2:3, :], vec2_ref[4:5, :], H2)
        h2b = _layer_norm(h2b, vec2_ref[3:4, :], vec2_ref[5:6, :], H2)
    h2a = _leaky_relu(h2a).astype(jnp.bfloat16)
    h2b = _leaky_relu(h2b).astype(jnp.bfloat16)

    # ---- final layer: both heads share the packed (H2, 2) weight ----
    qa = jnp.dot(h2a, w36_ref[...], preferred_element_type=jnp.float32)   # col 0 = Q1
    qb = jnp.dot(h2b, w36_ref[...], preferred_element_type=jnp.float32)   # col 1 = Q2
    bf_row = 6 if layer_norm else 2
    bf = vec2_ref[bf_row:bf_row + 1, 0:2]                                 # (1, 2)
    col = jax.lax.broadcasted_iota(jnp.int32, qa.shape, 1)
    q_ref[...] = (jnp.where(col == 0, qa, qb) + bf).astype(q_ref.dtype)


def _pad_cols(a, width):
    return jnp.pad(a, ((0, 0), (0, width - a.shape[1])))


def _round_up(v, m):
    return ((v + m - 1) // m) * m


@functools.partial(jax.jit, static_argnames=("layer_norm",))
def pourchot_critic_td3_forward(x, u, params, layer_norm=True):
    """Pallas implementation of PourchotCriticTD3.forward -> (Q1, Q2)."""
    B = x.shape[0]
    in_dim = x.shape[1] + u.shape[1]

    # Single concatenated input (tiny HBM concat; enables one fused layer-1 dot).
    xu = jnp.concatenate([x, u], axis=1).astype(jnp.float32)

    # ---- pack parameters (tiny XLA concats/pads/casts, fused under jit) ----
    w1f = jnp.concatenate([_pad_cols(params["w1"], H1P),
                           _pad_cols(params["w4"], H1P)],
                          axis=1).astype(jnp.bfloat16)                   # (in_dim, 2*H1P)
    b1f = jnp.concatenate([_pad_cols(params["b1"], H1P),
                           _pad_cols(params["b4"], H1P)], axis=1)        # (1, 2*H1P)
    if layer_norm:
        g1f = jnp.concatenate([_pad_cols(params["g1"], H1P),
                               _pad_cols(params["g4"], H1P)], axis=1)
        be1f = jnp.concatenate([_pad_cols(params["be1"], H1P),
                                _pad_cols(params["be4"], H1P)], axis=1)
        vec1 = jnp.concatenate([b1f, g1f, be1f], axis=0)                 # (3, 2*H1P) f32
    else:
        vec1 = b1f                                                       # (1, 2*H1P) f32

    w2p = jnp.pad(params["w2"], ((0, H1P - H1), (0, 0))).astype(jnp.bfloat16)  # (H1P, H2)
    w5p = jnp.pad(params["w5"], ((0, H1P - H1), (0, 0))).astype(jnp.bfloat16)  # (H1P, H2)

    bf_row = _pad_cols(jnp.concatenate([params["b3"], params["b6"]], axis=1), H2)
    if layer_norm:
        vec2 = jnp.concatenate([params["b2"], params["b5"],
                                params["g2"], params["g5"],
                                params["be2"], params["be5"], bf_row], axis=0)   # (7, H2)
    else:
        vec2 = jnp.concatenate([params["b2"], params["b5"], bf_row], axis=0)     # (3, H2)

    w36 = jnp.concatenate([params["w3"], params["w6"]],
                          axis=1).astype(jnp.bfloat16)                   # (H2, 2)

    # ---- batch tiling ----
    # Tiny RL batches: one grid step.  Moderate/large batches: at least two
    # steps so the "parallel" axis keeps both v7x TensorCores busy (negligible
    # ~0.35us/step overhead on single-TC v5e/v6e); tiles capped at 1024 rows.
    if B <= 64:
        tb = max(8, _round_up(B, 8))
    else:
        tb = min(1024, _round_up(pl.cdiv(B, 2), 8))
    b_pad = _round_up(B, tb)
    if b_pad != B:
        xu = jnp.pad(xu, ((0, b_pad - B), (0, 0)))

    batch_map = lambda i: (i, 0)
    const_map = lambda i: (0, 0)   # weights stay resident in VMEM across the grid

    q = pl.pallas_call(
        functools.partial(_critic_kernel, layer_norm),
        out_shape=jax.ShapeDtypeStruct((b_pad, 2), jnp.float32),
        grid=(b_pad // tb,),
        in_specs=[
            pl.BlockSpec((tb, in_dim), batch_map),
            pl.BlockSpec(w1f.shape, const_map),
            pl.BlockSpec(vec1.shape, const_map),
            pl.BlockSpec(w2p.shape, const_map),
            pl.BlockSpec(w5p.shape, const_map),
            pl.BlockSpec(vec2.shape, const_map),
            pl.BlockSpec(w36.shape, const_map),
        ],
        out_specs=pl.BlockSpec((tb, 2), batch_map),
        compiler_params=pltpu.CompilerParams(
            dimension_semantics=("parallel",),
        ),
    )(xu, w1f, vec1, w2p, w5p, vec2, w36)

    q = q[:B]
    return q[:, 0:1], q[:, 1:2]


def init_params(key, state_dim, action_dim, layer_norm=True, dtype=jnp.float32):
    """Deterministic parameter init (PyTorch-like uniform fan-in scaling)."""
    in_dim = state_dim + action_dim
    dims = [
        ("w1", (in_dim, H1)), ("b1", (1, H1)),
        ("w2", (H1, H2)),     ("b2", (1, H2)),
        ("w3", (H2, 1)),      ("b3", (1, 1)),
        ("w4", (in_dim, H1)), ("b4", (1, H1)),
        ("w5", (H1, H2)),     ("b5", (1, H2)),
        ("w6", (H2, 1)),      ("b6", (1, 1)),
    ]
    params = {}
    keys = jax.random.split(key, len(dims))
    fan_ins = [in_dim, in_dim, H1, H1, H2, H2, in_dim, in_dim, H1, H1, H2, H2]
    for (name, shape), k, fan_in in zip(dims, keys, fan_ins):
        bound = 1.0 / jnp.sqrt(jnp.float32(fan_in))
        params[name] = jax.random.uniform(k, shape, dtype, -bound, bound)
    if layer_norm:
        # nn.LayerNorm default init: weight = 1, bias = 0
        params["g1"], params["be1"] = jnp.ones((1, H1), dtype), jnp.zeros((1, H1), dtype)
        params["g2"], params["be2"] = jnp.ones((1, H2), dtype), jnp.zeros((1, H2), dtype)
        params["g4"], params["be4"] = jnp.ones((1, H1), dtype), jnp.zeros((1, H1), dtype)
        params["g5"], params["be5"] = jnp.ones((1, H2), dtype), jnp.zeros((1, H2), dtype)
    return params


def _reference_forward(x, u, params, layer_norm=True):
    """Pure-JAX f32 reference mirroring the PyTorch forward."""
    xu = jnp.concatenate([x, u], axis=1)

    def ln(h, g, b):
        mean = jnp.mean(h, axis=-1, keepdims=True)
        var = jnp.mean((h - mean) ** 2, axis=-1, keepdims=True)
        return (h - mean) / jnp.sqrt(var + LN_EPS) * g + b

    def branch(wA, bA, wB, bB, wC, bC, gA=None, beA=None, gB=None, beB=None):
        h = xu @ params[wA] + params[bA]
        if layer_norm:
            h = ln(h, params[gA], params[beA])
        h = _leaky_relu(h)
        h = h @ params[wB] + params[bB]
        if layer_norm:
            h = ln(h, params[gB], params[beB])
        h = _leaky_relu(h)
        return h @ params[wC] + params[bC]

    q1 = branch("w1", "b1", "w2", "b2", "w3", "b3", "g1", "be1", "g2", "be2")
    q2 = branch("w4", "b4", "w5", "b5", "w6", "b6", "g4", "be4", "g5", "be5")
    return q1, q2


if __name__ == "__main__":
    state_dim, action_dim, batch = 17, 6, 8

    key = jax.random.PRNGKey(0)
    k_params, k_x, k_u = jax.random.split(key, 3)
    x = jax.random.normal(k_x, (batch, state_dim), jnp.float32)
    u = jax.random.normal(k_u, (batch, action_dim), jnp.float32)

    for layer_norm in (True, False):
        params = init_params(k_params, state_dim, action_dim, layer_norm=layer_norm)

        q1, q2 = pourchot_critic_td3_forward(x, u, params, layer_norm=layer_norm)
        jax.block_until_ready((q1, q2))

        r1, r2 = _reference_forward(x, u, params, layer_norm=layer_norm)
        assert q1.shape == (batch, 1) and q2.shape == (batch, 1)
        # bf16 MXU matmuls (f32 accumulate / f32 LayerNorm) -> looser tolerance
        assert jnp.allclose(q1, r1, atol=5e-2, rtol=5e-2)
        assert jnp.allclose(q2, r2, atol=5e-2, rtol=5e-2)

    print("KERNEL_OK")
</pallas_src>

<mosaic_0001>
module attributes {stable_mosaic.version = 11 : i64} {
  func.func @_critic_kernel(%arg0: i32, %arg1: memref<8x23xf32, #tpu.memory_space<vmem>>, %arg2: memref<23x1024xbf16, #tpu.memory_space<vmem>>, %arg3: memref<3x1024xf32, #tpu.memory_space<vmem>>, %arg4: memref<512x300xbf16, #tpu.memory_space<vmem>>, %arg5: memref<512x300xbf16, #tpu.memory_space<vmem>>, %arg6: memref<7x300xf32, #tpu.memory_space<vmem>>, %arg7: memref<300x2xbf16, #tpu.memory_space<vmem>>, %arg8: memref<8x2xf32, #tpu.memory_space<vmem>>) attributes {dimension_semantics = [#tpu.dimension_semantics<parallel>], iteration_bounds = array<i64: 1>, scalar_prefetch = 0 : i64, scratch_operands = 0 : i64, tpu.core_type = #tpu.core_type<tc>, window_params = [{transform_indices = @transform_0, window_bounds = array<i64: 8, 23>}, {pipeline_mode = #tpu.pipeline_mode<synchronous>, transform_indices = @transform_1, window_bounds = array<i64: 23, 1024>}, {pipeline_mode = #tpu.pipeline_mode<synchronous>, transform_indices = @transform_2, window_bounds = array<i64: 3, 1024>}, {pipeline_mode = #tpu.pipeline_mode<synchronous>, transform_indices = @transform_3, window_bounds = array<i64: 512, 300>}, {pipeline_mode = #tpu.pipeline_mode<synchronous>, transform_indices = @transform_4, window_bounds = array<i64: 512, 300>}, {pipeline_mode = #tpu.pipeline_mode<synchronous>, transform_indices = @transform_5, window_bounds = array<i64: 7, 300>}, {pipeline_mode = #tpu.pipeline_mode<synchronous>, transform_indices = @transform_6, window_bounds = array<i64: 300, 2>}, {transform_indices = @transform_7, window_bounds = array<i64: 8, 2>}]} {
    %c0 = arith.constant 0 : index
    %c0_0 = arith.constant 0 : index
    %0 = vector.load %arg1[%c0, %c0_0] : memref<8x23xf32, #tpu.memory_space<vmem>>, vector<8x23xf32>
    %1 = arith.truncf %0 : vector<8x23xf32> to vector<8x23xbf16>
    %c0_1 = arith.constant 0 : index
    %c0_2 = arith.constant 0 : index
    %2 = vector.load %arg2[%c0_1, %c0_2] : memref<23x1024xbf16, #tpu.memory_space<vmem>>, vector<23x1024xbf16>
    %cst = arith.constant dense<0.000000e+00> : vector<8x1024xf32>
    %3 = tpu.matmul %1, %2, %cst {dimension_numbers = #tpu.dot_dimension_numbers<[1], [0], [0], [1], [0, 0, 1, 1], [], []>} : vector<8x23xbf16>, vector<23x1024xbf16>, vector<8x1024xf32> -> vector<8x1024xf32>
    %c0_3 = arith.constant 0 : index
    %c0_4 = arith.constant 0 : index
    %4 = vector.load %arg3[%c0_3, %c0_4] : memref<3x1024xf32, #tpu.memory_space<vmem>>, vector<1x1024xf32>
    %5 = vector.broadcast %4 : vector<1x1024xf32> to vector<8x1024xf32>
    %6 = arith.addf %3, %5 : vector<8x1024xf32>
    %7 = vector.extract_strided_slice %6 {offsets = [0, 0], sizes = [8, 512], strides = [1, 1]} : vector<8x1024xf32> to vector<8x512xf32>
    %8 = vector.extract_strided_slice %6 {offsets = [0, 512], sizes = [8, 512], strides = [1, 1]} : vector<8x1024xf32> to vector<8x512xf32>
    %c1 = arith.constant 1 : index
    %c0_5 = arith.constant 0 : index
    %9 = vector.load %arg3[%c1, %c0_5] : memref<3x1024xf32, #tpu.memory_space<vmem>>, vector<1x512xf32>
    %c2 = arith.constant 2 : index
    %c0_6 = arith.constant 0 : index
    %10 = vector.load %arg3[%c2, %c0_6] : memref<3x1024xf32, #tpu.memory_space<vmem>>, vector<1x512xf32>
    %cst_7 = arith.constant dense<0.000000e+00> : vector<8xf32>
    %11 = vector.multi_reduction <add>, %7, %cst_7 [1] : vector<8x512xf32> to vector<8xf32>
    %12 = vector.shape_cast %11 : vector<8xf32> to vector<8x1xf32>
    %13 = arith.mulf %7, %7 : vector<8x512xf32>
    %cst_8 = arith.constant dense<0.000000e+00> : vector<8xf32>
    %14 = vector.multi_reduction <add>, %13, %cst_8 [1] : vector<8x512xf32> to vector<8xf32>
    %15 = vector.shape_cast %14 : vector<8xf32> to vector<8x1xf32>
    %cst_9 = arith.constant 2.500000e-03 : f32
    %16 = vector.broadcast %cst_9 : f32 to vector<8x1xf32>
    %17 = arith.mulf %12, %16 : vector<8x1xf32>
    %cst_10 = arith.constant 2.500000e-03 : f32
    %18 = vector.broadcast %cst_10 : f32 to vector<8x1xf32>
    %19 = arith.mulf %15, %18 : vector<8x1xf32>
    %20 = arith.mulf %17, %17 : vector<8x1xf32>
    %21 = arith.subf %19, %20 : vector<8x1xf32>
    %cst_11 = arith.constant 0.000000e+00 : f32
    %22 = vector.broadcast %cst_11 : f32 to vector<8x1xf32>
    %23 = arith.maximumf %21, %22 : vector<8x1xf32>
    %cst_12 = arith.constant 9.99999974E-6 : f32
    %24 = vector.broadcast %cst_12 : f32 to vector<8x1xf32>
    %25 = arith.addf %23, %24 : vector<8x1xf32>
    %26 = math.rsqrt %25 : vector<8x1xf32>
    %27 = vector.broadcast %17 : vector<8x1xf32> to vector<8x512xf32>
    %28 = arith.subf %7, %27 : vector<8x512xf32>
    %29 = vector.broadcast %26 : vector<8x1xf32> to vector<8x512xf32>
    %30 = arith.mulf %28, %29 : vector<8x512xf32>
    %31 = vector.broadcast %9 : vector<1x512xf32> to vector<8x512xf32>
    %32 = arith.mulf %30, %31 : vector<8x512xf32>
    %33 = vector.broadcast %10 : vector<1x512xf32> to vector<8x512xf32>
    %34 = arith.addf %32, %33 : vector<8x512xf32>
    %c1_13 = arith.constant 1 : index
    %c512 = arith.constant 512 : index
    %35 = vector.load %arg3[%c1_13, %c512] : memref<3x1024xf32, #tpu.memory_space<vmem>>, vector<1x512xf32>
    %c2_14 = arith.constant 2 : index
    %c512_15 = arith.constant 512 : index
    %36 = vector.load %arg3[%c2_14, %c512_15] : memref<3x1024xf32, #tpu.memory_space<vmem>>, vector<1x512xf32>
    %cst_16 = arith.constant dense<0.000000e+00> : vector<8xf32>
    %37 = vector.multi_reduction <add>, %8, %cst_16 [1] : vector<8x512xf32> to vector<8xf32>
    %38 = vector.shape_cast %37 : vector<8xf32> to vector<8x1xf32>
    %39 = arith.mulf %8, %8 : vector<8x512xf32>
    %cst_17 = arith.constant dense<0.000000e+00> : vector<8xf32>
    %40 = vector.multi_reduction <add>, %39, %cst_17 [1] : vector<8x512xf32> to vector<8xf32>
    %41 = vector.shape_cast %40 : vector<8xf32> to vector<8x1xf32>
    %cst_18 = arith.constant 2.500000e-03 : f32
    %42 = vector.broadcast %cst_18 : f32 to vector<8x1xf32>
    %43 = arith.mulf %38, %42 : vector<8x1xf32>
    %cst_19 = arith.constant 2.500000e-03 : f32
    %44 = vector.broadcast %cst_19 : f32 to vector<8x1xf32>
    %45 = arith.mulf %41, %44 : vector<8x1xf32>
    %46 = arith.mulf %43, %43 : vector<8x1xf32>
    %47 = arith.subf %45, %46 : vector<8x1xf32>
    %cst_20 = arith.constant 0.000000e+00 : f32
    %48 = vector.broadcast %cst_20 : f32 to vector<8x1xf32>
    %49 = arith.maximumf %47, %48 : vector<8x1xf32>
    %cst_21 = arith.constant 9.99999974E-6 : f32
    %50 = vector.broadcast %cst_21 : f32 to vector<8x1xf32>
    %51 = arith.addf %49, %50 : vector<8x1xf32>
    %52 = math.rsqrt %51 : vector<8x1xf32>
    %53 = vector.broadcast %43 : vector<8x1xf32> to vector<8x512xf32>
    %54 = arith.subf %8, %53 : vector<8x512xf32>
    %55 = vector.broadcast %52 : vector<8x1xf32> to vector<8x512xf32>
    %56 = arith.mulf %54, %55 : vector<8x512xf32>
    %57 = vector.broadcast %35 : vector<1x512xf32> to vector<8x512xf32>
    %58 = arith.mulf %56, %57 : vector<8x512xf32>
    %59 = vector.broadcast %36 : vector<1x512xf32> to vector<8x512xf32>
    %60 = arith.addf %58, %59 : vector<8x512xf32>
    %cst_22 = arith.constant 0.000000e+00 : f32
    %61 = vector.broadcast %cst_22 : f32 to vector<8x512xf32>
    %62 = arith.cmpf ogt, %34, %61 : vector<8x512xf32>
    %cst_23 = arith.constant 0.00999999977 : f32
    %63 = vector.broadcast %cst_23 : f32 to vector<8x512xf32>
    %64 = arith.mulf %63, %34 : vector<8x512xf32>
    %65 = arith.select %62, %34, %64 : vector<8x512xi1>, vector<8x512xf32>
    %66 = arith.truncf %65 : vector<8x512xf32> to vector<8x512xbf16>
    %cst_24 = arith.constant 0.000000e+00 : f32
    %67 = vector.broadcast %cst_24 : f32 to vector<8x512xf32>
    %68 = arith.cmpf ogt, %60, %67 : vector<8x512xf32>
    %cst_25 = arith.constant 0.00999999977 : f32
    %69 = vector.broadcast %cst_25 : f32 to vector<8x512xf32>
    %70 = arith.mulf %69, %60 : vector<8x512xf32>
    %71 = arith.select %68, %60, %70 : vector<8x512xi1>, vector<8x512xf32>
    %72 = arith.truncf %71 : vector<8x512xf32> to vector<8x512xbf16>
    %c0_26 = arith.constant 0 : index
    %c0_27 = arith.constant 0 : index
    %73 = vector.load %arg4[%c0_26, %c0_27] : memref<512x300xbf16, #tpu.memory_space<vmem>>, vector<512x300xbf16>
    %cst_28 = arith.constant dense<0.000000e+00> : vector<8x300xf32>
    %74 = tpu.matmul %66, %73, %cst_28 {dimension_numbers = #tpu.dot_dimension_numbers<[1], [0], [0], [1], [0, 0, 1, 1], [], []>} : vector<8x512xbf16>, vector<512x300xbf16>, vector<8x300xf32> -> vector<8x300xf32>
    %c0_29 = arith.constant 0 : index
    %c0_30 = arith.constant 0 : index
    %75 = vector.load %arg6[%c0_29, %c0_30] : memref<7x300xf32, #tpu.memory_space<vmem>>, vector<1x300xf32>
    %76 = vector.broadcast %75 : vector<1x300xf32> to vector<8x300xf32>
    %77 = arith.addf %74, %76 : vector<8x300xf32>
    %c0_31 = arith.constant 0 : index
    %c0_32 = arith.constant 0 : index
    %78 = vector.load %arg5[%c0_31, %c0_32] : memref<512x300xbf16, #tpu.memory_space<vmem>>, vector<512x300xbf16>
    %cst_33 = arith.constant dense<0.000000e+00> : vector<8x300xf32>
    %79 = tpu.matmul %72, %78, %cst_33 {dimension_numbers = #tpu.dot_dimension_numbers<[1], [0], [0], [1], [0, 0, 1, 1], [], []>} : vector<8x512xbf16>, vector<512x300xbf16>, vector<8x300xf32> -> vector<8x300xf32>
    %c1_34 = arith.constant 1 : index
    %c0_35 = arith.constant 0 : index
    %80 = vector.load %arg6[%c1_34, %c0_35] : memref<7x300xf32, #tpu.memory_space<vmem>>, vector<1x300xf32>
    %81 = vector.broadcast %80 : vector<1x300xf32> to vector<8x300xf32>
    %82 = arith.addf %79, %81 : vector<8x300xf32>
    %c2_36 = arith.constant 2 : index
    %c0_37 = arith.constant 0 : index
    %83 = vector.load %arg6[%c2_36, %c0_37] : memref<7x300xf32, #tpu.memory_space<vmem>>, vector<1x300xf32>
    %c4 = arith.constant 4 : index
    %c0_38 = arith.constant 0 : index
    %84 = vector.load %arg6[%c4, %c0_38] : memref<7x300xf32, #tpu.memory_space<vmem>>, vector<1x300xf32>
    %cst_39 = arith.constant dense<0.000000e+00> : vector<8xf32>
    %85 = vector.multi_reduction <add>, %77, %cst_39 [1] : vector<8x300xf32> to vector<8xf32>
    %86 = vector.shape_cast %85 : vector<8xf32> to vector<8x1xf32>
    %87 = arith.mulf %77, %77 : vector<8x300xf32>
    %cst_40 = arith.constant dense<0.000000e+00> : vector<8xf32>
    %88 = vector.multi_reduction <add>, %87, %cst_40 [1] : vector<8x300xf32> to vector<8xf32>
    %89 = vector.shape_cast %88 : vector<8xf32> to vector<8x1xf32>
    %cst_41 = arith.constant 0.00333333341 : f32
    %90 = vector.broadcast %cst_41 : f32 to vector<8x1xf32>
    %91 = arith.mulf %86, %90 : vector<8x1xf32>
    %cst_42 = arith.constant 0.00333333341 : f32
    %92 = vector.broadcast %cst_42 : f32 to vector<8x1xf32>
    %93 = arith.mulf %89, %92 : vector<8x1xf32>
    %94 = arith.mulf %91, %91 : vector<8x1xf32>
    %95 = arith.subf %93, %94 : vector<8x1xf32>
    %cst_43 = arith.constant 0.000000e+00 : f32
    %96 = vector.broadcast %cst_43 : f32 to vector<8x1xf32>
    %97 = arith.maximumf %95, %96 : vector<8x1xf32>
    %cst_44 = arith.constant 9.99999974E-6 : f32
    %98 = vector.broadcast %cst_44 : f32 to vector<8x1xf32>
    %99 = arith.addf %97, %98 : vector<8x1xf32>
    %100 = math.rsqrt %99 : vector<8x1xf32>
    %101 = vector.broadcast %91 : vector<8x1xf32> to vector<8x300xf32>
    %102 = arith.subf %77, %101 : vector<8x300xf32>
    %103 = vector.broadcast %100 : vector<8x1xf32> to vector<8x300xf32>
    %104 = arith.mulf %102, %103 : vector<8x300xf32>
    %105 = vector.broadcast %83 : vector<1x300xf32> to vector<8x300xf32>
    %106 = arith.mulf %104, %105 : vector<8x300xf32>
    %107 = vector.broadcast %84 : vector<1x300xf32> to vector<8x300xf32>
    %108 = arith.addf %106, %107 : vector<8x300xf32>
    %c3 = arith.constant 3 : index
    %c0_45 = arith.constant 0 : index
    %109 = vector.load %arg6[%c3, %c0_45] : memref<7x300xf32, #tpu.memory_space<vmem>>, vector<1x300xf32>
    %c5 = arith.constant 5 : index
    %c0_46 = arith.constant 0 : index
    %110 = vector.load %arg6[%c5, %c0_46] : memref<7x300xf32, #tpu.memory_space<vmem>>, vector<1x300xf32>
    %cst_47 = arith.constant dense<0.000000e+00> : vector<8xf32>
    %111 = vector.multi_reduction <add>, %82, %cst_47 [1] : vector<8x300xf32> to vector<8xf32>
    %112 = vector.shape_cast %111 : vector<8xf32> to vector<8x1xf32>
    %113 = arith.mulf %82, %82 : vector<8x300xf32>
    %cst_48 = arith.constant dense<0.000000e+00> : vector<8xf32>
    %114 = vector.multi_reduction <add>, %113, %cst_48 [1] : vector<8x300xf32> to vector<8xf32>
    %115 = vector.shape_cast %114 : vector<8xf32> to vector<8x1xf32>
    %cst_49 = arith.constant 0.00333333341 : f32
    %116 = vector.broadcast %cst_49 : f32 to vector<8x1xf32>
    %117 = arith.mulf %112, %116 : vector<8x1xf32>
    %cst_50 = arith.constant 0.00333333341 : f32
    %118 = vector.broadcast %cst_50 : f32 to vector<8x1xf32>
    %119 = arith.mulf %115, %118 : vector<8x1xf32>
    %120 = arith.mulf %117, %117 : vector<8x1xf32>
    %121 = arith.subf %119, %120 : vector<8x1xf32>
    %cst_51 = arith.constant 0.000000e+00 : f32
    %122 = vector.broadcast %cst_51 : f32 to vector<8x1xf32>
    %123 = arith.maximumf %121, %122 : vector<8x1xf32>
    %cst_52 = arith.constant 9.99999974E-6 : f32
    %124 = vector.broadcast %cst_52 : f32 to vector<8x1xf32>
    %125 = arith.addf %123, %124 : vector<8x1xf32>
    %126 = math.rsqrt %125 : vector<8x1xf32>
    %127 = vector.broadcast %117 : vector<8x1xf32> to vector<8x300xf32>
    %128 = arith.subf %82, %127 : vector<8x300xf32>
    %129 = vector.broadcast %126 : vector<8x1xf32> to vector<8x300xf32>
    %130 = arith.mulf %128, %129 : vector<8x300xf32>
    %131 = vector.broadcast %109 : vector<1x300xf32> to vector<8x300xf32>
    %132 = arith.mulf %130, %131 : vector<8x300xf32>
    %133 = vector.broadcast %110 : vector<1x300xf32> to vector<8x300xf32>
    %134 = arith.addf %132, %133 : vector<8x300xf32>
    %cst_53 = arith.constant 0.000000e+00 : f32
    %135 = vector.broadcast %cst_53 : f32 to vector<8x300xf32>
    %136 = arith.cmpf ogt, %108, %135 : vector<8x300xf32>
    %cst_54 = arith.constant 0.00999999977 : f32
    %137 = vector.broadcast %cst_54 : f32 to vector<8x300xf32>
    %138 = arith.mulf %137, %108 : vector<8x300xf32>
    %139 = arith.select %136, %108, %138 : vector<8x300xi1>, vector<8x300xf32>
    %140 = arith.truncf %139 : vector<8x300xf32> to vector<8x300xbf16>
    %cst_55 = arith.constant 0.000000e+00 : f32
    %141 = vector.broadcast %cst_55 : f32 to vector<8x300xf32>
    %142 = arith.cmpf ogt, %134, %141 : vector<8x300xf32>
    %cst_56 = arith.constant 0.00999999977 : f32
    %143 = vector.broadcast %cst_56 : f32 to vector<8x300xf32>
    %144 = arith.mulf %143, %134 : vector<8x300xf32>
    %145 = arith.select %142, %134, %144 : vector<8x300xi1>, vector<8x300xf32>
    %146 = arith.truncf %145 : vector<8x300xf32> to vector<8x300xbf16>
    %c0_57 = arith.constant 0 : index
    %c0_58 = arith.constant 0 : index
    %147 = vector.load %arg7[%c0_57, %c0_58] : memref<300x2xbf16, #tpu.memory_space<vmem>>, vector<300x2xbf16>
    %cst_59 = arith.constant dense<0.000000e+00> : vector<8x2xf32>
    %148 = tpu.matmul %140, %147, %cst_59 {dimension_numbers = #tpu.dot_dimension_numbers<[1], [0], [0], [1], [0, 0, 1, 1], [], []>} : vector<8x300xbf16>, vector<300x2xbf16>, vector<8x2xf32> -> vector<8x2xf32>
    %c0_60 = arith.constant 0 : index
    %c0_61 = arith.constant 0 : index
    %149 = vector.load %arg7[%c0_60, %c0_61] : memref<300x2xbf16, #tpu.memory_space<vmem>>, vector<300x2xbf16>
    %cst_62 = arith.constant dense<0.000000e+00> : vector<8x2xf32>
    %150 = tpu.matmul %146, %149, %cst_62 {dimension_numbers = #tpu.dot_dimension_numbers<[1], [0], [0], [1], [0, 0, 1, 1], [], []>} : vector<8x300xbf16>, vector<300x2xbf16>, vector<8x2xf32> -> vector<8x2xf32>
    %c6 = arith.constant 6 : index
    %c0_63 = arith.constant 0 : index
    %151 = vector.load %arg6[%c6, %c0_63] : memref<7x300xf32, #tpu.memory_space<vmem>>, vector<1x2xf32>
    %152 = tpu.iota {dimensions = array<i32: 1>} : vector<8x2xi32>
    %c0_i32 = arith.constant 0 : i32
    %153 = vector.broadcast %c0_i32 : i32 to vector<8x2xi32>
    %154 = arith.cmpi eq, %152, %153 : vector<8x2xi32>
    %155 = arith.select %154, %148, %150 : vector<8x2xi1>, vector<8x2xf32>
    %156 = vector.broadcast %151 : vector<1x2xf32> to vector<8x2xf32>
    %157 = arith.addf %155, %156 : vector<8x2xf32>
    %c0_64 = arith.constant 0 : index
    %c0_65 = arith.constant 0 : index
    %158 = vector.load %arg8[%c0_64, %c0_65] : memref<8x2xf32, #tpu.memory_space<vmem>>, vector<8x2xf32>
    tpu.vector_store %arg8[%c0_64, %c0_65], %157 {strides = array<i32>} : memref<8x2xf32, #tpu.memory_space<vmem>>, vector<8x2xf32>,
    return
  }
  func.func @transform_0(%arg0: i32) -> (i32, i32) {
    %c0_i32 = arith.constant 0 : i32
    %c0_i32_0 = arith.constant 0 : i32
    return %arg0, %c0_i32 : i32, i32
  }
  func.func @transform_1(%arg0: i32) -> (i32, i32) {
    %c0_i32 = arith.constant 0 : i32
    %c0_i32_0 = arith.constant 0 : i32
    %c0_i32_1 = arith.constant 0 : i32
    return %c0_i32, %c0_i32_0 : i32, i32
  }
  func.func @transform_2(%arg0: i32) -> (i32, i32) {
    %c0_i32 = arith.constant 0 : i32
    %c0_i32_0 = arith.constant 0 : i32
    %c0_i32_1 = arith.constant 0 : i32
    return %c0_i32, %c0_i32_0 : i32, i32
  }
  func.func @transform_3(%arg0: i32) -> (i32, i32) {
    %c0_i32 = arith.constant 0 : i32
    %c0_i32_0 = arith.constant 0 : i32
    %c0_i32_1 = arith.constant 0 : i32
    return %c0_i32, %c0_i32_0 : i32, i32
  }
  func.func @transform_4(%arg0: i32) -> (i32, i32) {
    %c0_i32 = arith.constant 0 : i32
    %c0_i32_0 = arith.constant 0 : i32
    %c0_i32_1 = arith.constant 0 : i32
    return %c0_i32, %c0_i32_0 : i32, i32
  }
  func.func @transform_5(%arg0: i32) -> (i32, i32) {
    %c0_i32 = arith.constant 0 : i32
    %c0_i32_0 = arith.constant 0 : i32
    %c0_i32_1 = arith.constant 0 : i32
    return %c0_i32, %c0_i32_0 : i32, i32
  }
  func.func @transform_6(%arg0: i32) -> (i32, i32) {
    %c0_i32 = arith.constant 0 : i32
    %c0_i32_0 = arith.constant 0 : i32
    %c0_i32_1 = arith.constant 0 : i32
    return %c0_i32, %c0_i32_0 : i32, i32
  }
  func.func @transform_7(%arg0: i32) -> (i32, i32) {
    %c0_i32 = arith.constant 0 : i32
    %c0_i32_0 = arith.constant 0 : i32
    return %arg0, %c0_i32 : i32, i32
  }
}

</mosaic_0001>

<bundles_post_ra>
// kernel: pourchot_critic_td3_forward.1
= control target key start
LH: loop header
LB: loop body
LE: loop exit
PB: predicated region body
PF: predicated region fallthrough
CT: control target
= control target key end

     0   :  { %vm123_vm0 = vcmask 1042432   ;;  %vm124_vm1 = vcmask 1043456   ;;  %v3549_v1 = vmov 65535   ;;  %vm119_vm2 = vcmask 187392   ;;  %s5160_s1 = inlined_call_operand.vmem [shape: bf16[23,1024], index: 1, kind: input, shape index: {}]   ;;  %s5161_s0 = inlined_call_operand.vmem [shape: f32[8,23], index: 0, kind: input, shape index: {}]   ;;  %s5162_s2 = inlined_call_operand.vmem [shape: f32[3,1024], index: 2, kind: input, shape index: {}]   ;;  %s5163_s3 = inlined_call_operand.vmem [shape: bf16[512,300], index: 3, kind: input, shape index: {}]   ;;  %s5164_s4 = inlined_call_operand.vmem [shape: bf16[512,300], index: 4, kind: input, shape index: {}]   ;;  %s5165_s5 = inlined_call_operand.vmem [shape: f32[7,300], index: 5, kind: input, shape index: {}]   ;;  %s5166_s6 = inlined_call_operand.vmem [shape: bf16[300,2], index: 6, kind: input, shape index: {}]   ;;  %s5167_s7 = inlined_call_operand.vmem [shape: f32[8,2], index: 7, kind: output, shape index: {}]  }
   0x1   :  { %v37_v0 = vld [vmem:[%s5160_s1 + $0x40] sm:$0xff]  ;;  %v125_v2 = vsel %vm123_vm0, 4294967295, %v3549_v1  ;;  %v38_v3 = vld [vmem:[%s5160_s1 + $0x48] sm:$0xff]  ;;  %v40_v16 = vld [vmem:[%s5160_s1 + $0x58] sm:$0xff] }
   0x2   :  { %v87_v4 = vunpack.c.l.b16 %v37_v0  ;;  %v88_v5 = vunpack.c.h.b16 %v37_v0  ;;  %v89_v6 = vunpack.c.l.b16 %v38_v3  ;;  %v2428_v7 = vld [vmem:[%s5160_s1] sm:$0xf]  ;;  %v3602_v9 = vsel %vm124_vm1, %v125_v2, 0  ;;  %v3321_v14 = vld [vmem:[%s5160_s1 + $0x4] sm:$0xf]  ;;  %v39_v22 = vld [vmem:[%s5160_s1 + $0x50] sm:$0xff] }
   0x3   :  { %v3325_v8 = vld [vmem:[%s5160_s1 + $0x1c] sm:$0xf0]  ;;  %v90_v10 = vunpack.c.h.b16 %v38_v3  ;;  %v2430_v15 = vld [vmem:[%s5160_s1 + $0x20] sm:$0xf0]  ;;  %v2436_v19 = vld [vmem:[%s5160_s1 + $0x8] sm:$0xf]  ;;  %v93_v21 = vunpack.c.l.b16 %v40_v16  ;;  %v94_v28 = vunpack.c.h.b16 %v40_v16  ;;  %v91_v31 = vunpack.c.l.b16 %v39_v22 }
   0x4   :  { %v103_v11 = vpack.c.b16 %v87_v4, %v87_v4  ;;  %v104_v12 = vpack.c.b16 %v88_v5, %v88_v5  ;;  %v105_v13 = vpack.c.b16 %v89_v6, %v89_v6  ;;  %v2429_v18 = vor.u32 %v3325_v8, %v2428_v7  ;;  %v3326_v20 = vld [vmem:[%s5160_s1 + $0x24] sm:$0xf0]  ;;  %v3322_v26 = vld [vmem:[%s5160_s1 + $0xc] sm:$0xf]  ;;  %v27_v35 = vld [vmem:[%s5161_s0] sm:$0xff] }
   0x5   :  { %v106_v17 = vpack.c.b16 %v90_v10, %v90_v10  ;;  %v2438_v27 = vld [vmem:[%s5160_s1 + $0x28] sm:$0xf0]  ;;  %v109_v30 = vpack.c.b16 %v93_v21, %v93_v21  ;;  %v92_v32 = vunpack.c.h.b16 %v39_v22  ;;  %v2433_v33 = vor.u32 %v3321_v14, %v2430_v15  ;;  %v2452_v42 = vld [vmem:[%s5160_s1 + $0x18] sm:$0xf]  ;;  %v3324_v45 = vld [vmem:[%s5160_s1 + $0x1c] sm:$0xf] }
   0x6   :  { %v128_v23 = vand.u32 %v3602_v9, %v103_v11  ;;  %v131_v24 = vand.u32 %v3602_v9, %v104_v12  ;;  %v134_v25 = vand.u32 %v3602_v9, %v105_v13  ;;  %v2437_v34 = vor.u32 %v3326_v20, %v2436_v19  ;;  %v3328_v44 = vld [vmem:[%s5160_s1 + $0x34] sm:$0xf0]  ;;  %v2454_v46 = vld [vmem:[%s5160_s1 + $0x38] sm:$0xf0]  ;;  %v2444_v49 = vld [vmem:[%s5160_s1 + $0x10] sm:$0xf] }
   0x7   :  { %v137_v29 = vand.u32 %v3602_v9, %v106_v17  ;;  %v110_v36 = vpack.c.b16 %v94_v28, %v94_v28  ;;  %v2441_v37 = vor.u32 %v3322_v26, %v2438_v27  ;;  %v107_v38 = vpack.c.b16 %v91_v31, %v91_v31  ;;  %v3327_v52 = vld [vmem:[%s5160_s1 + $0x2c] sm:$0xf0]  ;;  %v3323_v53 = vld [vmem:[%s5160_s1 + $0x14] sm:$0xf]  ;;  %v2556_v3 = vld [vmem:[%s5163_s3 + $0xa8] sm:$0xf] }
   0x8   :  { %157 = vmatpush.bf16.msra.mxu0 %v128_v23  ;;  %170 = vmatpush.bf16.msra.mxu1 %v131_v24  ;;  %v108_v39 = vpack.c.b16 %v92_v32, %v92_v32  ;;  %v146_v40 = vand.u32 %v3602_v9, %v109_v30  ;;  %v28_v43 = vpack.c.bf16 %v27_v35, %v27_v35  ;;  %v2446_v54 = vld [vmem:[%s5160_s1 + $0x30] sm:$0xf0]  ;;  %v2652_v5 = vld [vmem:[%s5163_s3 + $0x168] sm:$0xf]  ;;  %v2544_v22 = vld [vmem:[%s5163_s3 + $0x90] sm:$0xf] }
   0x9   :  { %183 = vmatpush.bf16.msra.mxu2 %v134_v25  ;;  %196 = vmatpush.bf16.msra.mxu3 %v137_v29  ;;  %v149_v41 = vand.u32 %v3602_v9, %v110_v36  ;;  %v140_v47 = vand.u32 %v3602_v9, %v107_v38  ;;  %v2453_v50 = vor.u32 %v3328_v44, %v2452_v42  ;;  %v3674_v57 = vld [vmem:[%s5162_s2] ss:$4 sm:$0xff]  ;;  %vm2037_vm1 = vcmask 359424  }
   0xa   :  { %v143_v48 = vand.u32 %v3602_v9, %v108_v39  ;;  %v2457_v51 = vor.u32 %v3324_v45, %v2454_v46  ;;  %v2445_v55 = vor.u32 %v3327_v52, %v2444_v49  ;;  %v2449_v56 = vor.u32 %v3323_v53, %v2446_v54  ;;  %v3351_v4 = vld [vmem:[%s5163_s3 + $0xb0] sm:$0xf0]  ;;  %v2748_v12 = vld [vmem:[%s5163_s3 + $0x228] sm:$0xf]  ;;  %v3348_v24 = vld [vmem:[%s5163_s3 + $0x98] sm:$0xf0] }
   0xb   :  { %v43_v58 = vperm.slane %v3674_v57, 0  ;;  %v44_v59 = vperm.slane %v3674_v57, 1  ;;  %v45_v0 = vperm.slane %v3674_v57, 2  ;;  %v46_v1 = vperm.slane %v3674_v57, 3  ;;  %v3375_v11 = vld [vmem:[%s5163_s3 + $0x170] sm:$0xf0] }
   0xc   :  { %158 = vmatpush.bf16.msra.mxu0 %v2429_v18  ;;  %171 = vmatpush.bf16.msra.mxu1 %v2433_v33  ;;  %v2557_v10 = vor.u32 %v3351_v4, %v2556_v3  ;;  %v3399_v13 = vld [vmem:[%s5163_s3 + $0x230] sm:$0xf0]  ;;  %v2653_v18 = vor.u32 %v3375_v11, %v2652_v5  ;;  %v2844_v20 = vld [vmem:[%s5163_s3 + $0x2e8] sm:$0xf]  ;;  %v2640_v25 = vld [vmem:[%s5163_s3 + $0x150] sm:$0xf]  ;;  %v2545_v31 = vor.u32 %v3348_v24, %v2544_v22 }
   0xd   :  { %184 = vmatpush.bf16.msra.mxu2 %v2437_v34  ;;  %197 = vmatpush.bf16.msra.mxu3 %v2441_v37  ;;  %v2749_v19 = vor.u32 %v3399_v13, %v2748_v12  ;;  %v3423_v21 = vld [vmem:[%s5163_s3 + $0x2f0] sm:$0xf0]  ;;  %v3372_v26 = vld [vmem:[%s5163_s3 + $0x158] sm:$0xf0]  ;;  %v2736_v28 = vld [vmem:[%s5163_s3 + $0x210] sm:$0xf] }
   0xe   :  { %v2845_v23 = vor.u32 %v3423_v21, %v2844_v20  ;;  %v3396_v29 = vld [vmem:[%s5163_s3 + $0x218] sm:$0xf0]  ;;  %v2832_v30 = vld [vmem:[%s5163_s3 + $0x2d0] sm:$0xf]  ;;  %v2641_v32 = vor.u32 %v3372_v26, %v2640_v25  ;;  %v2532_v35 = vld [vmem:[%s5163_s3 + $0x78] sm:$0xf] }
   0xf   :  { %2458 = vmatmul.msk.bf16.vlgmr.msra.gmra.mxu0 %vm119_vm2, %v28_v43  ;;  %2459 = vmatmul.msk.bf16.vlgmr.msra.gmra.mxu1 %vm119_vm2, %v28_v43  ;;  %v2737_v33 = vor.u32 %v3396_v29, %v2736_v28  ;;  %v3420_v34 = vld [vmem:[%s5163_s3 + $0x2d8] sm:$0xf0]  ;;  %v3345_v36 = vld [vmem:[%s5163_s3 + $0x80] sm:$0xf0]  ;;  %v2820_v46 = vld [vmem:[%s5163_s3 + $0x2b8] sm:$0xf] }
  0x10   :  { %2460 = vmatmul.msk.bf16.vlgmr.msra.gmra.mxu2 %vm119_vm2, %v28_v43  ;;  %2461 = vmatmul.msk.bf16.vlgmr.msra.gmra.mxu3 %vm119_vm2, %v28_v43  ;;  %v3369_v42 = vld [vmem:[%s5163_s3 + $0x140] sm:$0xf0]  ;;  %v2533_v44 = vor.u32 %v3345_v36, %v2532_v35  ;;  %v48_v49 = vperm.slane %v3674_v57, 5  ;;  %v3342_v52 = vld [vmem:[%s5163_s3 + $0x68] sm:$0xf0]  ;;  %v49_v13 = vperm.slane %v3674_v57, 6 }
  0x11   :  { %235 = vmatpush.bf16.msrb.mxu2 %v146_v40  ;;  %248 = vmatpush.bf16.msrb.mxu3 %v149_v41  ;;  %v2833_v40 = vor.u32 %v3420_v34, %v2832_v30  ;;  %v2628_v41 = vld [vmem:[%s5163_s3 + $0x138] sm:$0xf]  ;;  %v3393_v45 = vld [vmem:[%s5163_s3 + $0x200] sm:$0xf0]  ;;  %v3390_v3 = vld [vmem:[%s5163_s3 + $0x1e8] sm:$0xf0] }
  0x12   :  { %209 = vmatpush.bf16.msrb.mxu0 %v140_v47  ;;  %222 = vmatpush.bf16.msrb.mxu1 %v143_v48  ;;  %v3417_v47 = vld [vmem:[%s5163_s3 + $0x2c0] sm:$0xf0]  ;;  %v47_v48 = vperm.slane %v3674_v57, 4  ;;  %v2808_v4 = vld [vmem:[%s5163_s3 + $0x2a0] sm:$0xf] }
  0x13   :  { %v3414_v5 = vld [vmem:[%s5163_s3 + $0x2a8] sm:$0xf0]  ;;  %v2508_v34 = vld [vmem:[%s5163_s3 + $0x48] sm:$0xf]  ;;  %v3339_v35 = vld [vmem:[%s5163_s3 + $0x50] sm:$0xf0] }
  0x14   :  { %v2809_v11 = vor.u32 %v3414_v5, %v2808_v4  ;;  %v2604_v36 = vld [vmem:[%s5163_s3 + $0x108] sm:$0xf] }
  0x15   :  { %236 = vmatpush.bf16.msrb.mxu2 %v2453_v50  ;;  %249 = vmatpush.bf16.msrb.mxu3 %v2457_v51  ;;  %v2629_v50 = vor.u32 %v3369_v42, %v2628_v41  ;;  %v2520_v51 = vld [vmem:[%s5163_s3 + $0x60] sm:$0xf] }
  0x16   :  { %210 = vmatpush.bf16.msrb.mxu0 %v2445_v55  ;;  %223 = vmatpush.bf16.msrb.mxu1 %v2449_v56  ;;  %v2821_v56 = vor.u32 %v3417_v47, %v2820_v46  ;;  %v3336_v47 = vld [vmem:[%s5163_s3 + $0x38] sm:$0xf0] }
  0x19   :  { %1097 = vmatpush.bf16.msra.mxu2 %v2749_v19  ;;  %1110 = vmatpush.bf16.msra.mxu3 %v2845_v23 }
  0x1a   :  { %1071 = vmatpush.bf16.msra.mxu0 %v2557_v10  ;;  %1084 = vmatpush.bf16.msra.mxu1 %v2653_v18 }
  0x1d   :  { %1098 = vmatpush.bf16.msra.mxu2 %v2737_v33  ;;  %1111 = vmatpush.bf16.msra.mxu3 %v2833_v40  ;;  %v3387_v40 = vld [vmem:[%s5163_s3 + $0x1d0] sm:$0xf0] }
  0x1e   :  { %1072 = vmatpush.bf16.msra.mxu0 %v2545_v31  ;;  %1085 = vmatpush.bf16.msra.mxu1 %v2641_v32 }
  0x1f   :  { %2462 = vmatmul.msk.bf16.vlgmr.msrb.gmra.mxu0 %vm119_vm2, %v28_v43  ;;  %2463 = vmatmul.msk.bf16.vlgmr.msrb.gmra.mxu1 %vm119_vm2, %v28_v43 }
  0x20   :  { %2464 = vmatmul.msk.bf16.vlgmr.msrb.gmra.mxu2 %vm119_vm2, %v28_v43  ;;  %2465 = vmatmul.msk.bf16.vlgmr.msrb.gmra.mxu3 %vm119_vm2, %v28_v43  ;;  %v2724_v43 = vld [vmem:[%s5163_s3 + $0x1f8] sm:$0xf]  ;;  %vm2329_vm2 = vcmask 1045504  }
  0x21   :  { %v2725_v55 = vor.u32 %v3393_v45, %v2724_v43  ;;  %1112 = vmatpush.bf16.msra.mxu3 %v2821_v56  ;;  %v2796_v43 = vld [vmem:[%s5163_s3 + $0x288] sm:$0xf]  ;;  %v2496_v45 = vld [vmem:[%s5163_s3 + $0x30] sm:$0xf]  ;;  %v3408_v56 = vld [vmem:[%s5163_s3 + $0x278] sm:$0xf0] }
  0x22   :  { %1073 = vmatpush.bf16.msra.mxu0 %v2533_v44  ;;  %1086 = vmatpush.bf16.msra.mxu1 %v2629_v50  ;;  %v3411_v44 = vld [vmem:[%s5163_s3 + $0x290] sm:$0xf0]  ;;  %v2497_v50 = vor.u32 %v3336_v47, %v2496_v45  ;;  %v2738_v45 = vld [vmem:[%s5163_s3 + $0x21c] sm:$0xf0] }
  0x23   :  { %1099 = vmatpush.bf16.msra.mxu2 %v2725_v55  ;;  %v2797_v46 = vor.u32 %v3411_v44, %v2796_v43  ;;  %v3395_v43 = vld [vmem:[%s5163_s3 + $0x214] sm:$0xf]  ;;  %v2834_v47 = vld [vmem:[%s5163_s3 + $0x2dc] sm:$0xf0] }
  0x25   :  { %1113 = vmatpush.bf16.msra.mxu3 %v2809_v11  ;;  %v2472_v11 = vld [vmem:[%s5163_s3] sm:$0xf] }
  0x29   :  { %1114 = vmatpush.bf16.msra.mxu3 %v2797_v46  ;;  %v3419_v46 = vld [vmem:[%s5163_s3 + $0x2d4] sm:$0xf] }
  0x8c   :  { %v160_v60 = vpop.f32.mrf.mxu0  ;;  %v173_v61 = vpop.f32.mrf.mxu1 }
  0x8d   :  { %v3678_v62 = vadd.f32 %v160_v60, %v43_v58  ;;  %v3680_v63 = vadd.f32 %v173_v61, %v44_v59  ;;  %v2616_v58 = vld [vmem:[%s5163_s3 + $0x120] sm:$0xf]  ;;  %v3366_v59 = vld [vmem:[%s5163_s3 + $0x128] sm:$0xf0] }
  0x8e   :  { %v2712_v60 = vld [vmem:[%s5163_s3 + $0x1e0] sm:$0xf] }
  0x8f   :  { %v259_v2 = vadd.f32 %v3680_v63, %v3678_v62  ;;  %v264_v6 = vmul.f32 %v3678_v62, %v3678_v62  ;;  %v265_v7 = vmul.f32 %v3680_v63, %v3680_v63  ;;  %v2713_v10 = vor.u32 %v3390_v3, %v2712_v60  ;;  %v3333_v60 = vld [vmem:[%s5163_s3 + $0x20] sm:$0xf0] }
  0x90   :  { %v3381_v3 = vld [vmem:[%s5163_s3 + $0x1a0] sm:$0xf0] }
  0x91   :  { %v268_v39 = vadd.f32 %v265_v7, %v264_v6  ;;  %v2521_v6 = vor.u32 %v3342_v52, %v2520_v51  ;;  %1100 = vmatpush.bf16.msra.mxu2 %v2713_v10  ;;  %v2688_v52 = vld [vmem:[%s5163_s3 + $0x1b0] sm:$0xf] }
  0x93   :  { %v186_v8 = vpop.f32.mrf.mxu2  ;;  %v199_v9 = vpop.f32.mrf.mxu3  ;;  %1074 = vmatpush.bf16.msra.mxu0 %v2521_v6  ;;  %v2772_v6 = vld [vmem:[%s5163_s3 + $0x258] sm:$0xf] }
  0x94   :  { %v3708_v14 = vadd.f32 %v186_v8, %v45_v0  ;;  %v3710_v15 = vadd.f32 %v199_v9, %v46_v1  ;;  %v162_v16 = vpop.f32.mrf.mxu0  ;;  %v175_v17 = vpop.f32.mrf.mxu1  ;;  %v2617_v9 = vor.u32 %v3366_v59, %v2616_v58  ;;  %v2484_v59 = vld [vmem:[%s5163_s3 + $0x18] sm:$0xf] }
  0x95   :  { %v50_v16 = vperm.slane %v3674_v57, 7 }
  0x96   :  { %v260_v27 = vadd.f32 %v259_v2, %v3708_v14  ;;  %v266_v37 = vmul.f32 %v3708_v14, %v3708_v14  ;;  %v267_v1 = vmul.f32 %v3710_v15, %v3710_v15  ;;  %1087 = vmatpush.bf16.msra.mxu1 %v2617_v9  ;;  %v3405_v9 = vld [vmem:[%s5163_s3 + $0x260] sm:$0xf0] }
  0x97   :  { %v2773_v10 = vor.u32 %v3405_v9, %v2772_v6  ;;  %v3389_v6 = vld [vmem:[%s5163_s3 + $0x1e4] sm:$0xf]  ;;  %v2714_v9 = vld [vmem:[%s5163_s3 + $0x1ec] sm:$0xf0] }
  0x98   :  { %v261_v38 = vadd.f32 %v260_v27, %v3710_v15  ;;  %v269_v2 = vadd.f32 %v268_v39, %v266_v37  ;;  %v2509_v37 = vor.u32 %v3339_v35, %v2508_v34  ;;  %v2700_v39 = vld [vmem:[%s5163_s3 + $0x1c8] sm:$0xf]  ;;  %v3422_v34 = vld [vmem:[%s5163_s3 + $0x2ec] sm:$0xf] }
  0x99   :  { %v2701_v42 = vor.u32 %v3387_v40, %v2700_v39 }
  0x9a   :  { %262 = vadd.xlane.f32.xlu0 %v261_v38  ;;  %v270_v12 = vadd.f32 %v269_v2, %v267_v1  ;;  %v3363_v38 = vld [vmem:[%s5163_s3 + $0x110] sm:$0xf0]  ;;  %1075 = vmatpush.bf16.msra.mxu0 %v2509_v37  ;;  %v3357_v1 = vld [vmem:[%s5163_s3 + $0xe0] sm:$0xf0]  ;;  %v2676_v2 = vld [vmem:[%s5163_s3 + $0x198] sm:$0xf] }
  0x9b   :  { %v188_v53 = vpop.f32.mrf.mxu2  ;;  %v201_v54 = vpop.f32.mrf.mxu3  ;;  %v2605_v41 = vor.u32 %v3363_v38, %v2604_v36  ;;  %1101 = vmatpush.bf16.msra.mxu2 %v2701_v42  ;;  %v2677_v5 = vor.u32 %v3381_v3, %v2676_v2  ;;  %v2846_v36 = vld [vmem:[%s5163_s3 + $0x2f4] sm:$0xf0]  ;;  %v3347_v37 = vld [vmem:[%s5163_s3 + $0x94] sm:$0xf]  ;;  %v2546_v38 = vld [vmem:[%s5163_s3 + $0x9c] sm:$0xf0] }
  0x9c   :  { %v212_v61 = vpop.f32.mrf.mxu0  ;;  %v225_v0 = vpop.f32.mrf.mxu1  ;;  %v3384_v53 = vld [vmem:[%s5163_s3 + $0x1b8] sm:$0xf0]  ;;  %v2784_v54 = vld [vmem:[%s5163_s3 + $0x270] sm:$0xf]  ;;  %v2849_v39 = vor.u32 %v3422_v34, %v2846_v36  ;;  %v2549_v40 = vor.u32 %v3347_v37, %v2546_v38  ;;  %v2642_v42 = vld [vmem:[%s5163_s3 + $0x15c] sm:$0xf0] }
  0x9d   :  { %v3798_v7 = vadd.f32 %v212_v61, %v47_v48  ;;  %v3800_v8 = vadd.f32 %v225_v0, %v48_v49  ;;  %v2592_v48 = vld [vmem:[%s5163_s3 + $0xf0] sm:$0xf]  ;;  %v3360_v49 = vld [vmem:[%s5163_s3 + $0xf8] sm:$0xf0]  ;;  %1088 = vmatpush.bf16.msra.mxu1 %v2605_v41  ;;  %v2689_v55 = vor.u32 %v3384_v53, %v2688_v52  ;;  %v2785_v58 = vor.u32 %v3408_v56, %v2784_v54  ;;  %v2580_v61 = vld [vmem:[%s5163_s3 + $0xd8] sm:$0xf] }
  0x9e   :  { %v2593_v51 = vor.u32 %v3360_v49, %v2592_v48  ;;  %1076 = vmatpush.bf16.msra.mxu0 %v2497_v50  ;;  %v2485_v0 = vor.u32 %v3333_v60, %v2484_v59  ;;  %v2581_v4 = vor.u32 %v3357_v1, %v2580_v61  ;;  %v3371_v41 = vld [vmem:[%s5163_s3 + $0x154] sm:$0xf]  ;;  %v2741_v48 = vor.u32 %v3395_v43, %v2738_v45  ;;  %v3344_v50 = vld [vmem:[%s5163_s3 + $0x7c] sm:$0xf]  ;;  %v2630_v54 = vld [vmem:[%s5163_s3 + $0x144] sm:$0xf0] }
  0x9f   :  { %v332_v17 = vmul.f32 %v3798_v7, %v3798_v7  ;;  %v333_v18 = vmul.f32 %v3800_v8, %v3800_v8  ;;  %v327_v19 = vadd.f32 %v3800_v8, %v3798_v7  ;;  %1102 = vmatpush.bf16.msra.mxu2 %v2689_v55  ;;  %1115 = vmatpush.bf16.msra.mxu3 %v2785_v58  ;;  %v3368_v52 = vld [vmem:[%s5163_s3 + $0x13c] sm:$0xf]  ;;  %v2726_v56 = vld [vmem:[%s5163_s3 + $0x204] sm:$0xf0]  ;;  %v3341_v1 = vld [vmem:[%s5163_s3 + $0x64] sm:$0xf] }
  0xa0   :  { %v2645_v44 = vor.u32 %v3371_v41, %v2642_v42  ;;  %v2837_v49 = vor.u32 %v3419_v46, %v2834_v47  ;;  %v3392_v55 = vld [vmem:[%s5163_s3 + $0x1fc] sm:$0xf]  ;;  %v2633_v58 = vor.u32 %v3368_v52, %v2630_v54  ;;  %v2822_v61 = vld [vmem:[%s5163_s3 + $0x2c4] sm:$0xf0]  ;;  %v2522_v2 = vld [vmem:[%s5163_s3 + $0x6c] sm:$0xf0] }
  0xa1   :  { %v336_v27 = vadd.f32 %v333_v18, %v332_v17  ;;  %1089 = vmatpush.bf16.msra.mxu1 %v2593_v51  ;;  %v3354_v17 = vld [vmem:[%s5163_s3 + $0xc8] sm:$0xf0]  ;;  %v2664_v18 = vld [vmem:[%s5163_s3 + $0x180] sm:$0xf]  ;;  %v2534_v51 = vld [vmem:[%s5163_s3 + $0x84] sm:$0xf0]  ;;  %v2729_v59 = vor.u32 %v3392_v55, %v2726_v56 }
  0xa2   :  { %271 = vadd.xlane.f32.xlu0 %v270_v12  ;;  %1077 = vmatpush.bf16.msra.mxu0 %v2485_v0  ;;  %v3330_v12 = vld [vmem:[%s5163_s3 + $0x8] sm:$0xf0]  ;;  %v2537_v53 = vor.u32 %v3344_v50, %v2534_v51  ;;  %v3416_v60 = vld [vmem:[%s5163_s3 + $0x2bc] sm:$0xf]  ;;  %v3365_v3 = vld [vmem:[%s5163_s3 + $0x124] sm:$0xf] }
  0xa3   :  { %v238_v20 = vpop.f32.mrf.mxu2  ;;  %v251_v21 = vpop.f32.mrf.mxu3  ;;  %1103 = vmatpush.bf16.msra.mxu2 %v2677_v5  ;;  %1116 = vmatpush.bf16.msra.mxu3 %v2773_v10  ;;  %v2825_v0 = vor.u32 %v3416_v60, %v2822_v61  ;;  %v2618_v5 = vld [vmem:[%s5163_s3 + $0x12c] sm:$0xf0]  ;;  %v3383_v36 = vld [vmem:[%s5163_s3 + $0x1b4] sm:$0xf]  ;;  %v2690_v37 = vld [vmem:[%s5163_s3 + $0x1bc] sm:$0xf0] }
  0xa4   :  { %v3810_v22 = vadd.f32 %v238_v20, %v49_v13  ;;  %v3812_v23 = vadd.f32 %v251_v21, %v50_v16  ;;  %v214_v57 = vpop.f32.mrf.mxu0  ;;  %v227_v24 = vpop.f32.mrf.mxu1  ;;  %v2568_v13 = vld [vmem:[%s5163_s3 + $0xc0] sm:$0xf]  ;;  %v2473_v16 = vor.u32 %v3330_v12, %v2472_v11  ;;  %v2621_v10 = vor.u32 %v3365_v3, %v2618_v5  ;;  %v3413_v12 = vld [vmem:[%s5163_s3 + $0x2a4] sm:$0xf]  ;;  %v3407_v41 = vld [vmem:[%s5163_s3 + $0x274] sm:$0xf] }
  0xa5   :  { %1090 = vmatpush.bf16.msra.mxu1 %v2581_v4  ;;  %v2569_v20 = vor.u32 %v3354_v17, %v2568_v13  ;;  %v2760_v57 = vld [vmem:[%s5163_s3 + $0x240] sm:$0xf]  ;;  %v3402_v24 = vld [vmem:[%s5163_s3 + $0x248] sm:$0xf0]  ;;  %v2525_v4 = vor.u32 %v3341_v1, %v2522_v2  ;;  %v2717_v11 = vor.u32 %v3389_v6, %v2714_v9  ;;  %v2810_v13 = vld [vmem:[%s5163_s3 + $0x2ac] sm:$0xf0] }
  0xa6   :  { %v334_v25 = vmul.f32 %v3810_v22, %v3810_v22  ;;  %v328_v26 = vadd.f32 %v327_v19, %v3810_v22  ;;  %v335_v29 = vmul.f32 %v3812_v23, %v3812_v23  ;;  %v3378_v19 = vld [vmem:[%s5163_s3 + $0x188] sm:$0xf0]  ;;  %1078 = vmatpush.bf16.msra.mxu0 %v2473_v16  ;;  %v2813_v16 = vor.u32 %v3413_v12, %v2810_v13  ;;  %v2786_v42 = vld [vmem:[%s5163_s3 + $0x27c] sm:$0xf0]  ;;  %v2486_v45 = vld [vmem:[%s5163_s3 + $0x24] sm:$0xf0] }
  0xa7   :  { %v2665_v21 = vor.u32 %v3378_v19, %v2664_v18  ;;  %v3338_v17 = vld [vmem:[%s5163_s3 + $0x4c] sm:$0xf]  ;;  %v2510_v18 = vld [vmem:[%s5163_s3 + $0x54] sm:$0xf0]  ;;  %v2789_v43 = vor.u32 %v3407_v41, %v2786_v42  ;;  %v3356_v46 = vld [vmem:[%s5163_s3 + $0xdc] sm:$0xf] }
  0xa8   :  { %v329_v28 = vadd.f32 %v328_v26, %v3812_v23  ;;  %v337_v30 = vadd.f32 %v336_v27, %v334_v25  ;;  %v3350_v25 = vld [vmem:[%s5163_s3 + $0xac] sm:$0xf]  ;;  %v2761_v26 = vor.u32 %v3402_v24, %v2760_v57  ;;  %v2558_v27 = vld [vmem:[%s5163_s3 + $0xb4] sm:$0xf0]  ;;  %v3380_v50 = vld [vmem:[%s5163_s3 + $0x19c] sm:$0xf] }
  0xa9   :  { %1091 = vmatpush.bf16.msra.mxu1 %v2569_v20  ;;  %1104 = vmatpush.bf16.msra.mxu2 %v2665_v21  ;;  %v3362_v19 = vld [vmem:[%s5163_s3 + $0x10c] sm:$0xf]  ;;  %v2513_v21 = vor.u32 %v3338_v17, %v2510_v18  ;;  %v2606_v57 = vld [vmem:[%s5163_s3 + $0x114] sm:$0xf0]  ;;  %v2678_v51 = vld [vmem:[%s5163_s3 + $0x1a4] sm:$0xf0] }
  0xaa   :  { %330 = vadd.xlane.f32.xlu1 %v329_v28  ;;  %v338_v33 = vadd.f32 %v337_v30, %v335_v29  ;;  %v3374_v28 = vld [vmem:[%s5163_s3 + $0x16c] sm:$0xf]  ;;  %v2654_v29 = vld [vmem:[%s5163_s3 + $0x174] sm:$0xf0]  ;;  %v2561_v30 = vor.u32 %v3350_v25, %v2558_v27  ;;  %1117 = vmatpush.bf16.msra.mxu3 %v2761_v26  ;;  %v2609_v26 = vor.u32 %v3362_v19, %v2606_v57  ;;  %v3404_v56 = vld [vmem:[%s5163_s3 + $0x25c] sm:$0xf] }
  0xab   :  { %v240_v31 = vpop.f32.mrf.mxu2  ;;  %v253_v32 = vpop.f32.mrf.mxu3  ;;  %v3386_v24 = vld [vmem:[%s5163_s3 + $0x1cc] sm:$0xf]  ;;  %v2702_v25 = vld [vmem:[%s5163_s3 + $0x1d4] sm:$0xf0]  ;;  %v2681_v55 = vor.u32 %v3380_v50, %v2678_v51  ;;  %v3329_v61 = vld [vmem:[%s5163_s3 + $0x4] sm:$0xf] }
  0xac   :  { %v2657_v31 = vor.u32 %v3374_v28, %v2654_v29  ;;  %v3398_v32 = vld [vmem:[%s5163_s3 + $0x22c] sm:$0xf]  ;;  %1123 = vmatpush.bf16.msrb.mxu0 %v2561_v30  ;;  %v2705_v27 = vor.u32 %v3386_v24, %v2702_v25  ;;  %v2798_v29 = vld [vmem:[%s5163_s3 + $0x294] sm:$0xf0]  ;;  %v3353_v1 = vld [vmem:[%s5163_s3 + $0xc4] sm:$0xf] }
  0xad   :  { %v3410_v28 = vld [vmem:[%s5163_s3 + $0x28c] sm:$0xf]  ;;  %v2570_v3 = vld [vmem:[%s5163_s3 + $0xcc] sm:$0xf0]  ;;  %v3352_v50 = vld [vmem:[%s5163_s3 + $0xb8] sm:$0xf0] }
  0xae   :  { %1136 = vmatpush.bf16.msrb.mxu1 %v2657_v31  ;;  %1162 = vmatpush.bf16.msrb.mxu3 %v2849_v39  ;;  %v2801_v30 = vor.u32 %v3410_v28, %v2798_v29  ;;  %v3335_v31 = vld [vmem:[%s5163_s3 + $0x34] sm:$0xf]  ;;  %v2666_v5 = vld [vmem:[%s5163_s3 + $0x18c] sm:$0xf0]  ;;  %v2573_v9 = vor.u32 %v3353_v1, %v2570_v3 }
  0xaf   :  { %v2762_v12 = vld [vmem:[%s5163_s3 + $0x24c] sm:$0xf0]  ;;  %v2466_v57 = vld [vmem:[%s5162_s2 + $0x1] ss:$4 sm:$0xf] }
  0xb0   :  { %1124 = vmatpush.bf16.msrb.mxu0 %v2549_v40  ;;  %v2693_v40 = vor.u32 %v3383_v36, %v2690_v37  ;;  %v2467_v28 = vld [vmem:[%s5162_s2 + $0x2] ss:$4 sm:$0xf]  ;;  %v299_v36 = vperm.slane %v2466_v57, 1  ;;  %v300_v37 = vperm.slane %v2466_v57, 2 }
  0xb1   :  { %v313_v41 = vperm.slane %v2467_v28, 2  ;;  %v314_v42 = vperm.slane %v2467_v28, 3 }
  0xb2   :  { %339 = vadd.xlane.f32.xlu1 %v338_v33  ;;  %v2750_v33 = vld [vmem:[%s5163_s3 + $0x234] sm:$0xf0]  ;;  %1137 = vmatpush.bf16.msrb.mxu1 %v2645_v44  ;;  %v3332_v44 = vld [vmem:[%s5163_s3 + $0x1c] sm:$0xf] }
  0xb3   :  { %v2753_v35 = vor.u32 %v3398_v32, %v2750_v33  ;;  %1163 = vmatpush.bf16.msrb.mxu3 %v2837_v49  ;;  %v2498_v32 = vld [vmem:[%s5163_s3 + $0x3c] sm:$0xf0]  ;;  %v3359_v33 = vld [vmem:[%s5163_s3 + $0xf4] sm:$0xf]  ;;  %v2582_v49 = vld [vmem:[%s5163_s3 + $0xe4] sm:$0xf0] }
  0xb4   :  { %1125 = vmatpush.bf16.msrb.mxu0 %v2537_v53  ;;  %v2501_v34 = vor.u32 %v3335_v31, %v2498_v32  ;;  %v2585_v54 = vor.u32 %v3356_v46, %v2582_v49  ;;  %v298_v32 = vperm.slane %v2466_v57, 0  ;;  %v2564_v49 = vld [vmem:[%s5163_s3 + $0xb0] sm:$0xf] }
  0xb5   :  { %1149 = vmatpush.bf16.msrb.mxu2 %v2753_v35  ;;  %v2594_v35 = vld [vmem:[%s5163_s3 + $0xfc] sm:$0xf0]  ;;  %v2565_v3 = vor.u32 %v3352_v50, %v2564_v49  ;;  %v3391_v49 = vld [vmem:[%s5163_s3 + $0x1f0] sm:$0xf0]  ;;  %v2816_v50 = vld [vmem:[%s5163_s3 + $0x2a8] sm:$0xf] }
  0xb6   :  { %1138 = vmatpush.bf16.msrb.mxu1 %v2633_v58  ;;  %v2597_v39 = vor.u32 %v3359_v33, %v2594_v35  ;;  %v2774_v58 = vld [vmem:[%s5163_s3 + $0x264] sm:$0xf0]  ;;  %v311_v35 = vperm.slane %v2467_v28, 0 }
  0xb7   :  { %1164 = vmatpush.bf16.msrb.mxu3 %v2825_v0  ;;  %v2474_v0 = vld [vmem:[%s5163_s3 + $0xc] sm:$0xf0] }
  0xb8   :  { %1126 = vmatpush.bf16.msrb.mxu0 %v2525_v4  ;;  %v2477_v2 = vor.u32 %v3329_v61, %v2474_v0  ;;  %v3377_v4 = vld [vmem:[%s5163_s3 + $0x184] sm:$0xf]  ;;  %v2852_v61 = vld [vmem:[%s5163_s3 + $0x2f0] sm:$0xf] }
  0xb9   :  { %1150 = vmatpush.bf16.msrb.mxu2 %v2741_v48  ;;  %v2489_v48 = vor.u32 %v3332_v44, %v2486_v45 }
  0xba   :  { %1139 = vmatpush.bf16.msrb.mxu1 %v2621_v10  ;;  %v2669_v10 = vor.u32 %v3377_v4, %v2666_v5  ;;  %v3424_v4 = vld [vmem:[%s5163_s3 + $0x2f8] sm:$0xf0] }
  0xbb   :  { %1165 = vmatpush.bf16.msrb.mxu3 %v2813_v16 }
  0xbc   :  { %1127 = vmatpush.bf16.msrb.mxu0 %v2513_v21 }
  0xbd   :  { %1151 = vmatpush.bf16.msrb.mxu2 %v2729_v59  ;;  %v2777_v59 = vor.u32 %v3404_v56, %v2774_v58  ;;  %v3376_v56 = vld [vmem:[%s5163_s3 + $0x178] sm:$0xf0]  ;;  %v2756_v58 = vld [vmem:[%s5163_s3 + $0x230] sm:$0xf] }
  0xbe   :  { %1140 = vmatpush.bf16.msrb.mxu1 %v2609_v26 }
  0xbf   :  { %1166 = vmatpush.bf16.msrb.mxu3 %v2801_v30 }
  0xc0   :  { %1128 = vmatpush.bf16.msrb.mxu0 %v2501_v34 }
  0xc1   :  { %1152 = vmatpush.bf16.msrb.mxu2 %v2717_v11  ;;  %v3401_v11 = vld [vmem:[%s5163_s3 + $0x244] sm:$0xf] }
  0xc2   :  { %1141 = vmatpush.bf16.msrb.mxu1 %v2597_v39  ;;  %v2765_v13 = vor.u32 %v3401_v11, %v2762_v12  ;;  %v301_v39 = vperm.slane %v2466_v57, 3 }
  0xc3   :  { %1167 = vmatpush.bf16.msrb.mxu3 %v2789_v43 }
  0xc4   :  { %1129 = vmatpush.bf16.msrb.mxu0 %v2489_v48 }
  0xc5   :  { %1153 = vmatpush.bf16.msrb.mxu2 %v2705_v27 }
  0xc6   :  { %1142 = vmatpush.bf16.msrb.mxu1 %v2585_v54 }
  0xc7   :  { %1168 = vmatpush.bf16.msrb.mxu3 %v2777_v59 }
  0xc8   :  { %1130 = vmatpush.bf16.msrb.mxu0 %v2477_v2 }
  0xc9   :  { %1154 = vmatpush.bf16.msrb.mxu2 %v2693_v40 }
  0xca   :  { %1143 = vmatpush.bf16.msrb.mxu1 %v2573_v9 }
  0xcb   :  { %1169 = vmatpush.bf16.msrb.mxu3 %v2765_v13 }
  0xcd   :  { %1155 = vmatpush.bf16.msrb.mxu2 %v2681_v55  ;;  %v2660_v55 = vld [vmem:[%s5163_s3 + $0x170] sm:$0xf] }
  0xd1   :  { %1156 = vmatpush.bf16.msrb.mxu2 %v2669_v10  ;;  %v2661_v10 = vor.u32 %v3376_v56, %v2660_v55  ;;  %v2516_v55 = vld [vmem:[%s5163_s3 + $0x50] sm:$0xf]  ;;  %v3340_v56 = vld [vmem:[%s5163_s3 + $0x58] sm:$0xf0] }
 0x10d   :  { %v263_v20 = vpop.xlane.xlu0 %262 }
 0x10e   :  { %v4054_v38 = vmul.f32 0.0025, %v263_v20 }
 0x110   :  { %v275_v52 = vmul.f32 %v4054_v38, %v4054_v38  ;;  %v289_v25 = vsub.f32 %v3678_v62, %v4054_v38  ;;  %v290_v29 = vsub.f32 %v3680_v63, %v4054_v38  ;;  %v291_v30 = vsub.f32 %v3708_v14, %v4054_v38 }
 0x111   :  { %v292_v31 = vsub.f32 %v3710_v15, %v4054_v38  ;;  %v312_v63 = vperm.slane %v2467_v28, 1 }
 0x115   :  { %v272_v47 = vpop.xlane.xlu0 %271 }
 0x116   :  { %v274_v53 = vmul.f32 0.0025, %v272_v47 }
 0x118   :  { %v276_v60 = vsub.f32 %v274_v53, %v275_v52 }
 0x11a   :  { %v277_v6 = vmax.f32 %v276_v60, 0.0  ;;  %v3400_v60 = vld [vmem:[%s5163_s3 + $0x238] sm:$0xf0] }
 0x11c   :  { %v278_v16 = vadd.f32 1e-05, %v277_v6 }
 0x11d   :  { %v331_v17 = vpop.xlane.xlu1 %330 }
 0x11e   :  { %3541 = vrsqrt.f32 %v278_v16  ;;  %v4117_v27 = vmul.f32 0.0025, %v331_v17  ;;  %vm285_vm4 = vweird.f32 %v278_v16  ;;  %v2552_v17 = vld [vmem:[%s5163_s3 + $0x98] sm:$0xf] }
 0x120   :  { %v343_v62 = vmul.f32 %v4117_v27, %v4117_v27 }
 0x124   :  { %v3542_v18 = vpop.eup %3541 }
 0x125   :  { %v280_v19 = vmul.f32 %v3542_v18, %v278_v16  ;;  %v340_v24 = vpop.xlane.xlu1 %339  ;;  %vm286_vm3 = vweird.f32 %v3542_v18  ;;  %v2757_v16 = vor.u32 %v3400_v60, %v2756_v58  ;;  %v2612_v60 = vld [vmem:[%s5163_s3 + $0x110] sm:$0xf] }
 0x126   :  { %v342_v34 = vmul.f32 0.0025, %v340_v24  ;;  %vm287_vm5 = vmor %vm285_vm4, %vm286_vm3  ;;  %v2853_v24 = vor.u32 %v3424_v4, %v2852_v61  ;;  %v3364_v61 = vld [vmem:[%s5163_s3 + $0x118] sm:$0xf0] }
 0x127   :  { %v281_v20 = vmul.f32 %v3542_v18, %v280_v19  ;;  %v2648_v19 = vld [vmem:[%s5163_s3 + $0x158] sm:$0xf]  ;;  %v3412_v4 = vld [vmem:[%s5163_s3 + $0x298] sm:$0xf0] }
 0x128   :  { %v344_v38 = vsub.f32 %v342_v34, %v343_v62  ;;  %v2540_v62 = vld [vmem:[%s5163_s3 + $0x80] sm:$0xf]  ;;  %v3346_v34 = vld [vmem:[%s5163_s3 + $0x88] sm:$0xf0] }
 0x129   :  { %v282_v21 = vmul.f32 0.5, %v281_v20 }
 0x12a   :  { %v345_v59 = vmax.f32 %v344_v38, 0.0 }
 0x12b   :  { %v283_v26 = vsub.f32 1.5, %v282_v21 }
 0x12c   :  { %v4167_v20 = vadd.f32 1e-05, %v345_v59 }
 0x12d   :  { %v284_v33 = vmul.f32 %v3542_v18, %v283_v26  ;;  %v2744_v26 = vld [vmem:[%s5163_s3 + $0x218] sm:$0xf] }
 0x12e   :  { %3543 = vrsqrt.f32 %v4167_v20  ;;  %vm353_vm10 = vweird.f32 %v4167_v20 }
 0x12f   :  { %v288_v40 = vsel %vm287_vm5, %v3542_v18, %v284_v33  ;;  %v3349_v18 = vld [vmem:[%s5163_s3 + $0xa0] sm:$0xf0] }
 0x130   :  { %v293_v14 = vmul.f32 %v289_v25, %v288_v40  ;;  %v294_v43 = vmul.f32 %v290_v29, %v288_v40  ;;  %v295_v44 = vmul.f32 %v291_v30, %v288_v40  ;;  %v296_v15 = vmul.f32 %v292_v31, %v288_v40  ;;  %v3373_v25 = vld [vmem:[%s5163_s3 + $0x160] sm:$0xf0]  ;;  %v2840_v30 = vld [vmem:[%s5163_s3 + $0x2d8] sm:$0xf]  ;;  %v2732_v40 = vld [vmem:[%s5163_s3 + $0x200] sm:$0xf] }
 0x131   :  { %v3397_v29 = vld [vmem:[%s5163_s3 + $0x220] sm:$0xf0]  ;;  %v2649_v33 = vor.u32 %v3373_v25, %v2648_v19  ;;  %v2696_v19 = vld [vmem:[%s5163_s3 + $0x1b8] sm:$0xf] }
 0x132   :  { %v306_v45 = vmul.f32 %v298_v32, %v293_v14  ;;  %v307_v46 = vmul.f32 %v299_v36, %v294_v43  ;;  %v308_v47 = vmul.f32 %v300_v37, %v295_v44  ;;  %v309_v48 = vmul.f32 %v301_v39, %v296_v15  ;;  %v3421_v31 = vld [vmem:[%s5163_s3 + $0x2e0] sm:$0xf0]  ;;  %v2636_v37 = vld [vmem:[%s5163_s3 + $0x140] sm:$0xf]  ;;  %v3370_v39 = vld [vmem:[%s5163_s3 + $0x148] sm:$0xf0] }
 0x133   :  { %v2553_v32 = vor.u32 %v3349_v18, %v2552_v17  ;;  %v2841_v36 = vor.u32 %v3421_v31, %v2840_v30  ;;  %v2541_v14 = vor.u32 %v3346_v34, %v2540_v62  ;;  %v2637_v43 = vor.u32 %v3370_v39, %v2636_v37  ;;  %v2528_v44 = vld [vmem:[%s5163_s3 + $0x68] sm:$0xf]  ;;  %v3343_v15 = vld [vmem:[%s5163_s3 + $0x70] sm:$0xf0]  ;;  %v2600_v17 = vld [vmem:[%s5163_s3 + $0xf8] sm:$0xf] }
 0x134   :  { %v319_v51 = vadd.f32 %v311_v35, %v306_v45  ;;  %v320_v52 = vadd.f32 %v312_v63, %v307_v46  ;;  %v321_v53 = vadd.f32 %v313_v41, %v308_v47  ;;  %v322_v54 = vadd.f32 %v314_v42, %v309_v48  ;;  %v3394_v63 = vld [vmem:[%s5163_s3 + $0x208] sm:$0xf0]  ;;  %v2828_v41 = vld [vmem:[%s5163_s3 + $0x2c0] sm:$0xf]  ;;  %v2624_v46 = vld [vmem:[%s5163_s3 + $0x128] sm:$0xf] }
 0x135   :  { %v2745_v35 = vor.u32 %v3397_v29, %v2744_v26  ;;  %v3418_v42 = vld [vmem:[%s5163_s3 + $0x2c8] sm:$0xf0]  ;;  %v2733_v38 = vor.u32 %v3394_v63, %v2732_v40  ;;  %v3367_v47 = vld [vmem:[%s5163_s3 + $0x130] sm:$0xf0]  ;;  %v2720_v48 = vld [vmem:[%s5163_s3 + $0x1e8] sm:$0xf] }
 0x136   :  { %vm391_vm6 = vcmp.gt.f32.partialorder %v319_v51, 0.0  ;;  %v395_v0 = vmul.f32 0.01, %v319_v51  ;;  %vm392_vm7 = vcmp.gt.f32.partialorder %v320_v52, 0.0  ;;  %v396_v1 = vmul.f32 0.01, %v320_v52 }
 0x137   :  { %vm393_vm8 = vcmp.gt.f32.partialorder %v321_v53, 0.0  ;;  %v397_v2 = vmul.f32 0.01, %v321_v53  ;;  %vm394_vm9 = vcmp.gt.f32.partialorder %v322_v54, 0.0  ;;  %v398_v9 = vmul.f32 0.01, %v322_v54 }
 0x138   :  { %v399_v5 = vsel %vm391_vm6, %v319_v51, %v395_v0  ;;  %v400_v6 = vsel %vm392_vm7, %v320_v52, %v396_v1  ;;  %v2829_v45 = vor.u32 %v3418_v42, %v2828_v41  ;;  %v3415_v51 = vld [vmem:[%s5163_s3 + $0x2b0] sm:$0xf0]  ;;  %v4242_v52 = vpop.eup %3543  ;;  %v2721_v58 = vor.u32 %v3391_v49, %v2720_v48  ;;  %v2708_v0 = vld [vmem:[%s5163_s3 + $0x1d0] sm:$0xf]  ;;  %v3361_v18 = vld [vmem:[%s5163_s3 + $0x100] sm:$0xf0] }
 0x139   :  { %v4154_v11 = vpack.c.bf16 %v399_v5, %v399_v5  ;;  %v4156_v12 = vpack.c.bf16 %v400_v6, %v400_v6  ;;  %v401_v13 = vsel %vm393_vm8, %v321_v53, %v397_v2  ;;  %v402_v57 = vsel %vm394_vm9, %v322_v54, %v398_v9  ;;  %v3388_v2 = vld [vmem:[%s5163_s3 + $0x1d8] sm:$0xf0]  ;;  %v2504_v9 = vld [vmem:[%s5163_s3 + $0x38] sm:$0xf]  ;;  %v3409_v26 = vld [vmem:[%s5163_s3 + $0x280] sm:$0xf0] }
 0x13a   :  { %v4169_v21 = vpack.c.bf16 %v401_v13, %v401_v13  ;;  %v4180_v28 = vpack.c.bf16 %v402_v57, %v402_v57  ;;  %v2529_v53 = vor.u32 %v3343_v15, %v2528_v44  ;;  %v2625_v54 = vor.u32 %v3367_v47, %v2624_v46  ;;  %v2792_v25 = vld [vmem:[%s5163_s3 + $0x278] sm:$0xf]  ;;  %v2492_v31 = vld [vmem:[%s5163_s3 + $0x20] sm:$0xf]  ;;  %v3382_v37 = vld [vmem:[%s5163_s3 + $0x1a8] sm:$0xf0] }
 0x13b   :  { %1079 = vmatmul.bf16.vlgmr.msra.gmra.mxu0 %v4154_v11  ;;  %1092 = vmatmul.bf16.vlgmr.msra.gmra.mxu1 %v4156_v12  ;;  %v2817_v59 = vor.u32 %v3415_v51, %v2816_v50  ;;  %v348_v1 = vmul.f32 %v4242_v52, %v4167_v20  ;;  %v2517_v5 = vor.u32 %v3340_v56, %v2516_v55  ;;  %v2780_v40 = vld [vmem:[%s5163_s3 + $0x260] sm:$0xf]  ;;  %v3406_v63 = vld [vmem:[%s5163_s3 + $0x268] sm:$0xf0]  ;;  %v2480_v42 = vld [vmem:[%s5163_s3 + $0x8] sm:$0xf]  ;;  %vm354_vm11 = vweird.f32 %v4242_v52 }
 0x13c   :  { %1105 = vmatmul.bf16.vlgmr.msra.gmra.mxu2 %v4169_v21  ;;  %1175 = vmatpush.bf16.msra.mxu0 %v2565_v3  ;;  %v2804_v3 = vld [vmem:[%s5163_s3 + $0x290] sm:$0xf]  ;;  %v2613_v6 = vor.u32 %v3364_v61, %v2612_v60  ;;  %v2709_v13 = vor.u32 %v3388_v2, %v2708_v0  ;;  %v2601_v30 = vor.u32 %v3361_v18, %v2600_v17  ;;  %v3355_v15 = vld [vmem:[%s5163_s3 + $0xd0] sm:$0xf0]  ;;  %v2768_v48 = vld [vmem:[%s5163_s3 + $0x248] sm:$0xf] }
 0x13d   :  { %1118 = vmatmul.bf16.vlgmr.msra.gmra.mxu3 %v4180_v28  ;;  %1188 = vmatpush.bf16.msra.mxu1 %v2661_v10  ;;  %v3337_v10 = vld [vmem:[%s5163_s3 + $0x40] sm:$0xf0]  ;;  %v349_v57 = vmul.f32 %v4242_v52, %v348_v1  ;;  %v2793_v34 = vor.u32 %v3409_v26, %v2792_v25  ;;  %v2781_v47 = vor.u32 %v3406_v63, %v2780_v40  ;;  %v2941_v49 = vld [vmem:[%s5164_s4 + $0xa8] sm:$0xf]  ;;  %v3447_v50 = vld [vmem:[%s5164_s4 + $0xb0] sm:$0xf0] }
 0x13e   :  { %1201 = vmatpush.bf16.msra.mxu2 %v2757_v16  ;;  %1214 = vmatpush.bf16.msra.mxu3 %v2853_v24  ;;  %v2805_v16 = vor.u32 %v3412_v4, %v2804_v3  ;;  %v3385_v24 = vld [vmem:[%s5163_s3 + $0x1c0] sm:$0xf0]  ;;  %v2505_v29 = vor.u32 %v3337_v10, %v2504_v9  ;;  %v3471_v56 = vld [vmem:[%s5164_s4 + $0x170] sm:$0xf0]  ;;  %v3133_v20 = vld [vmem:[%s5164_s4 + $0x228] sm:$0xf]  ;;  %v2942_v60 = vor.u32 %v3447_v50, %v2941_v49 }
 0x13f   :  { %v2697_v62 = vor.u32 %v3385_v24, %v2696_v19  ;;  %v350_v39 = vmul.f32 0.5, %v349_v57  ;;  %v3229_v61 = vld [vmem:[%s5164_s4 + $0x2e8] sm:$0xf]  ;;  %v3519_v0 = vld [vmem:[%s5164_s4 + $0x2f0] sm:$0xf0]  ;;  %vm4373_vm12 = vmor %vm353_vm10, %vm354_vm11  ;;  %v360_v49 = vsub.f32 %v3812_v23, %v4117_v27 }
 0x140   :  { %1176 = vmatpush.bf16.msra.mxu0 %v2553_v32  ;;  %v3334_v32 = vld [vmem:[%s5163_s3 + $0x28] sm:$0xf0]  ;;  %v2929_v9 = vld [vmem:[%s5164_s4 + $0x90] sm:$0xf]  ;;  %v3444_v10 = vld [vmem:[%s5164_s4 + $0x98] sm:$0xf0] }
 0x141   :  { %1189 = vmatpush.bf16.msra.mxu1 %v2649_v33  ;;  %v2588_v33 = vld [vmem:[%s5163_s3 + $0xe0] sm:$0xf]  ;;  %v2493_v41 = vor.u32 %v3334_v32, %v2492_v31  ;;  %v351_v51 = vsub.f32 1.5, %v350_v39  ;;  %v3468_v17 = vld [vmem:[%s5164_s4 + $0x158] sm:$0xf0]  ;;  %v2930_v25 = vor.u32 %v3444_v10, %v2929_v9 }
 0x142   :  { %1202 = vmatpush.bf16.msra.mxu2 %v2745_v35  ;;  %1215 = vmatpush.bf16.msra.mxu3 %v2841_v36  ;;  %v3358_v35 = vld [vmem:[%s5163_s3 + $0xe8] sm:$0xf0]  ;;  %v2684_v36 = vld [vmem:[%s5163_s3 + $0x1a0] sm:$0xf]  ;;  %v3121_v18 = vld [vmem:[%s5164_s4 + $0x210] sm:$0xf] }
 0x143   :  { %v2589_v44 = vor.u32 %v3358_v35, %v2588_v33  ;;  %v2685_v46 = vor.u32 %v3382_v37, %v2684_v36  ;;  %v352_v4 = vmul.f32 %v4242_v52, %v351_v51  ;;  %v3492_v19 = vld [vmem:[%s5164_s4 + $0x218] sm:$0xf0]  ;;  %v3217_v57 = vld [vmem:[%s5164_s4 + $0x2d0] sm:$0xf]  ;;  %v2917_v32 = vld [vmem:[%s5164_s4 + $0x78] sm:$0xf] }
 0x144   :  { %1177 = vmatpush.bf16.msra.mxu0 %v2541_v14  ;;  %v3331_v14 = vld [vmem:[%s5163_s3 + $0x10] sm:$0xf0]  ;;  %v3516_v24 = vld [vmem:[%s5164_s4 + $0x2d8] sm:$0xf0]  ;;  %v3122_v31 = vor.u32 %v3492_v19, %v3121_v18  ;;  %v3441_v33 = vld [vmem:[%s5164_s4 + $0x80] sm:$0xf0] }
 0x145   :  { %1190 = vmatpush.bf16.msra.mxu1 %v2637_v43  ;;  %v2576_v43 = vld [vmem:[%s5163_s3 + $0xc8] sm:$0xf]  ;;  %v2481_v55 = vor.u32 %v3331_v14, %v2480_v42  ;;  %v4405_v26 = vld [vmem:[%s5162_s2 + $0x11] ss:$4 sm:$0xf]  ;;  %v3218_v35 = vor.u32 %v3516_v24, %v3217_v57 }
 0x146   :  { %1203 = vmatpush.bf16.msra.mxu2 %v2733_v38  ;;  %1216 = vmatpush.bf16.msra.mxu3 %v2829_v45  ;;  %v2672_v38 = vld [vmem:[%s5163_s3 + $0x188] sm:$0xf]  ;;  %v3379_v45 = vld [vmem:[%s5163_s3 + $0x190] sm:$0xf0]  ;;  %v3465_v36 = vld [vmem:[%s5164_s4 + $0x140] sm:$0xf0] }
 0x147   :  { %v2673_v2 = vor.u32 %v3379_v45, %v2672_v38  ;;  %v3109_v37 = vld [vmem:[%s5164_s4 + $0x1f8] sm:$0xf]  ;;  %v3489_v39 = vld [vmem:[%s5164_s4 + $0x200] sm:$0xf0]  ;;  %v366_v40 = vperm.slane %v4405_v26, 0  ;;  %v367_v63 = vperm.slane %v4405_v26, 1 }
 0x148   :  { %1178 = vmatpush.bf16.msra.mxu0 %v2529_v53  ;;  %v3403_v53 = vld [vmem:[%s5163_s3 + $0x250] sm:$0xf0]  ;;  %v368_v42 = vperm.slane %v4405_v26, 2  ;;  %v3001_v38 = vld [vmem:[%s5164_s4 + $0x120] sm:$0xf] }
 0x149   :  { %1191 = vmatpush.bf16.msra.mxu1 %v2625_v54  ;;  %v3037_v54 = vld [vmem:[%s5164_s4 + $0x168] sm:$0xf]  ;;  %v2769_v3 = vor.u32 %v3403_v53, %v2768_v48  ;;  %v3486_v48 = vld [vmem:[%s5164_s4 + $0x1e8] sm:$0xf0]  ;;  %v3193_v50 = vld [vmem:[%s5164_s4 + $0x2a0] sm:$0xf] }
 0x14a   :  { %1204 = vmatpush.bf16.msra.mxu2 %v2721_v58  ;;  %1217 = vmatpush.bf16.msra.mxu3 %v2817_v59  ;;  %v3495_v58 = vld [vmem:[%s5164_s4 + $0x230] sm:$0xf0]  ;;  %v2577_v59 = vor.u32 %v3355_v15, %v2576_v43  ;;  %v2905_v15 = vld [vmem:[%s5164_s4 + $0x60] sm:$0xf]  ;;  %v3510_v51 = vld [vmem:[%s5164_s4 + $0x2a8] sm:$0xf0] }
 0x14b   :  { %1131 = vmatmul.bf16.vlgmr.msrb.gmra.mxu0 %v4154_v11  ;;  %1144 = vmatmul.bf16.vlgmr.msrb.gmra.mxu1 %v4156_v12  ;;  %v3194_v1 = vor.u32 %v3510_v51, %v3193_v50  ;;  %v3507_v9 = vld [vmem:[%s5164_s4 + $0x290] sm:$0xf0]  ;;  %v2881_v57 = vld [vmem:[%s5164_s4 + $0x30] sm:$0xf]  ;;  %v3432_v24 = vld [vmem:[%s5164_s4 + $0x38] sm:$0xf0] }
 0x14c   :  { %1157 = vmatmul.bf16.vlgmr.msrb.gmra.mxu2 %v4169_v21  ;;  %1179 = vmatpush.bf16.msra.mxu0 %v2517_v5  ;;  %v3038_v5 = vor.u32 %v3471_v56, %v3037_v54  ;;  %v3474_v50 = vld [vmem:[%s5164_s4 + $0x188] sm:$0xf0]  ;;  %v3145_v51 = vld [vmem:[%s5164_s4 + $0x240] sm:$0xf] }
 0x14d   :  { %1170 = vmatmul.bf16.vlgmr.msrb.gmra.mxu3 %v4180_v28  ;;  %1192 = vmatpush.bf16.msra.mxu1 %v2613_v6  ;;  %v3134_v6 = vor.u32 %v3495_v58, %v3133_v20 }
 0x14e   :  { %1205 = vmatpush.bf16.msra.mxu2 %v2709_v13  ;;  %1218 = vmatpush.bf16.msra.mxu3 %v2805_v16  ;;  %v3025_v13 = vld [vmem:[%s5164_s4 + $0x150] sm:$0xf]  ;;  %v3230_v16 = vor.u32 %v3519_v0, %v3229_v61  ;;  %v2989_v61 = vld [vmem:[%s5164_s4 + $0x108] sm:$0xf] }
 0x150   :  { %1180 = vmatpush.bf16.msra.mxu0 %v2505_v29  ;;  %v4410_v29 = vsel %vm4373_vm12, %v4242_v52, %v352_v4  ;;  %v357_v52 = vsub.f32 %v3798_v7, %v4117_v27  ;;  %v359_v7 = vsub.f32 %v3810_v22, %v4117_v27  ;;  %v3483_v4 = vld [vmem:[%s5164_s4 + $0x1d0] sm:$0xf0] }
 0x151   :  { %1193 = vmatpush.bf16.msra.mxu1 %v2601_v30  ;;  %v3026_v30 = vor.u32 %v3468_v17, %v3025_v13  ;;  %v369_v17 = vperm.slane %v4405_v26, 3 }
 0x152   :  { %1206 = vmatpush.bf16.msra.mxu2 %v2697_v62  ;;  %1219 = vmatpush.bf16.msra.mxu3 %v2793_v34  ;;  %v3013_v62 = vld [vmem:[%s5164_s4 + $0x138] sm:$0xf]  ;;  %v358_v34 = vsub.f32 %v3800_v8, %v4117_v27  ;;  %v363_v14 = vmul.f32 %v359_v7, %v4410_v29  ;;  %v3429_v7 = vld [vmem:[%s5164_s4 + $0x20] sm:$0xf0] }
 0x153   :  { %v3205_v8 = vld [vmem:[%s5164_s4 + $0x2b8] sm:$0xf]  ;;  %v3014_v43 = vor.u32 %v3465_v36, %v3013_v62  ;;  %v3504_v62 = vld [vmem:[%s5164_s4 + $0x278] sm:$0xf0] }
 0x154   :  { %1181 = vmatpush.bf16.msra.mxu0 %v2493_v41  ;;  %v361_v41 = vmul.f32 %v357_v52, %v4410_v29  ;;  %v362_v22 = vmul.f32 %v358_v34, %v4410_v29  ;;  %v376_v0 = vmul.f32 %v368_v42, %v363_v14  ;;  %v2882_v34 = vor.u32 %v3432_v24, %v2881_v57  ;;  %v3491_v57 = vld [vmem:[%s5164_s4 + $0x214] sm:$0xf]  ;;  %v3123_v24 = vld [vmem:[%s5164_s4 + $0x21c] sm:$0xf0] }
 0x155   :  { %1194 = vmatpush.bf16.msra.mxu1 %v2589_v44  ;;  %v3110_v44 = vor.u32 %v3489_v39, %v3109_v37  ;;  %v2869_v39 = vld [vmem:[%s5164_s4 + $0x18] sm:$0xf] }
 0x156   :  { %1207 = vmatpush.bf16.msra.mxu2 %v2685_v46  ;;  %1220 = vmatpush.bf16.msra.mxu3 %v2781_v47  ;;  %v3462_v46 = vld [vmem:[%s5164_s4 + $0x128] sm:$0xf0]  ;;  %v3097_v47 = vld [vmem:[%s5164_s4 + $0x1e0] sm:$0xf]  ;;  %v374_v56 = vmul.f32 %v366_v40, %v361_v41  ;;  %v375_v20 = vmul.f32 %v367_v63, %v362_v22  ;;  %v3453_v63 = vld [vmem:[%s5164_s4 + $0xe0] sm:$0xf0]  ;;  %v2870_v14 = vor.u32 %v3429_v7, %v2869_v39 }
 0x157   :  { %v3002_v23 = vor.u32 %v3462_v46, %v3001_v38  ;;  %v3098_v27 = vor.u32 %v3486_v48, %v3097_v47  ;;  %v3061_v41 = vld [vmem:[%s5164_s4 + $0x198] sm:$0xf]  ;;  %v3477_v22 = vld [vmem:[%s5164_s4 + $0x1a0] sm:$0xf0]  ;;  %v3450_v46 = vld [vmem:[%s5164_s4 + $0xc8] sm:$0xf0] }
 0x158   :  { %1182 = vmatpush.bf16.msra.mxu0 %v2481_v55  ;;  %v3062_v38 = vor.u32 %v3477_v22, %v3061_v41  ;;  %v3049_v47 = vld [vmem:[%s5164_s4 + $0x180] sm:$0xf]  ;;  %v3015_v7 = vld [vmem:[%s5164_s4 + $0x144] sm:$0xf0] }
 0x159   :  { %1195 = vmatpush.bf16.msra.mxu1 %v2577_v59  ;;  %v2893_v59 = vld [vmem:[%s5164_s4 + $0x48] sm:$0xf] }
 0x15a   :  { %1208 = vmatpush.bf16.msra.mxu2 %v2673_v2  ;;  %1221 = vmatpush.bf16.msra.mxu3 %v2769_v3  ;;  %v3459_v2 = vld [vmem:[%s5164_s4 + $0x110] sm:$0xf0]  ;;  %v3085_v3 = vld [vmem:[%s5164_s4 + $0x1c8] sm:$0xf] }
 0x15b   :  { %1183 = vmatmul.bf16.vlgmr.msra.gmra.mxu0 %v4154_v11  ;;  %v3513_v11 = vld [vmem:[%s5164_s4 + $0x2c0] sm:$0xf0]  ;;  %v2990_v18 = vor.u32 %v3459_v2, %v2989_v61  ;;  %v3086_v19 = vor.u32 %v3483_v4, %v3085_v3  ;;  %v3518_v61 = vld [vmem:[%s5164_s4 + $0x2ec] sm:$0xf] }
 0x15c   :  { %1876 = vmatpush.bf16.msrb.mxu0 %v2942_v60  ;;  %1196 = vmatmul.bf16.vlgmr.msra.gmra.mxu1 %v4156_v12  ;;  %v2918_v12 = vor.u32 %v3441_v33, %v2917_v32  ;;  %v3206_v45 = vor.u32 %v3513_v11, %v3205_v8  ;;  %v3435_v60 = vld [vmem:[%s5164_s4 + $0x50] sm:$0xf0]  ;;  %v3480_v32 = vld [vmem:[%s5164_s4 + $0x1b8] sm:$0xf0]  ;;  %v3169_v33 = vld [vmem:[%s5164_s4 + $0x270] sm:$0xf] }
 0x15d   :  { %1889 = vmatpush.bf16.msrb.mxu1 %v3038_v5  ;;  %1209 = vmatmul.bf16.vlgmr.msra.gmra.mxu2 %v4169_v21  ;;  %v4453_v21 = vld [vmem:[%s5162_s2 + $0x12] ss:$4 sm:$0xf]  ;;  %v364_v5 = vmul.f32 %v360_v49, %v4410_v29  ;;  %v2894_v10 = vor.u32 %v3435_v60, %v2893_v59  ;;  %v3170_v40 = vor.u32 %v3504_v62, %v3169_v33 }
 0x15e   :  { %1902 = vmatpush.bf16.msrb.mxu2 %v3134_v6  ;;  %1915 = vmatpush.bf16.msrb.mxu3 %v3230_v16  ;;  %v379_v53 = vperm.slane %v4453_v21, 0  ;;  %v380_v54 = vperm.slane %v4453_v21, 1  ;;  %v381_v58 = vperm.slane %v4453_v21, 2  ;;  %v3181_v6 = vld [vmem:[%s5164_s4 + $0x288] sm:$0xf]  ;;  %v382_v52 = vperm.slane %v4453_v21, 3 }
 0x15f   :  { %1222 = vmatmul.bf16.vlgmr.msra.gmra.mxu3 %v4180_v28  ;;  %v3438_v28 = vld [vmem:[%s5164_s4 + $0x68] sm:$0xf0]  ;;  %v3182_v26 = vor.u32 %v3507_v9, %v3181_v6  ;;  %v2965_v8 = vld [vmem:[%s5164_s4 + $0xd8] sm:$0xf]  ;;  %v377_v11 = vmul.f32 %v369_v17, %v364_v5  ;;  %v3501_v21 = vld [vmem:[%s5164_s4 + $0x260] sm:$0xf0]  ;;  %v3050_v60 = vor.u32 %v3474_v50, %v3049_v47 }
 0x160   :  { %1877 = vmatpush.bf16.msrb.mxu0 %v2930_v25  ;;  %v2906_v55 = vor.u32 %v3438_v28, %v2905_v15  ;;  %v4511_v13 = vadd.f32 %v379_v53, %v374_v56  ;;  %v4513_v16 = vadd.f32 %v380_v54, %v375_v20  ;;  %v2977_v25 = vld [vmem:[%s5164_s4 + $0xf0] sm:$0xf]  ;;  %v4525_v29 = vadd.f32 %v381_v58, %v376_v0  ;;  %v3498_v53 = vld [vmem:[%s5164_s4 + $0x248] sm:$0xf0]  ;;  %v3039_v58 = vld [vmem:[%s5164_s4 + $0x174] sm:$0xf0] }
 0x161   :  { %1890 = vmatpush.bf16.msrb.mxu1 %v3026_v30  ;;  %v3456_v30 = vld [vmem:[%s5164_s4 + $0xf8] sm:$0xf0]  ;;  %v2966_v28 = vor.u32 %v3453_v63, %v2965_v8  ;;  %v390_v48 = vadd.f32 %v382_v52, %v377_v11  ;;  %v3446_v54 = vld [vmem:[%s5164_s4 + $0xac] sm:$0xf]  ;;  %v3231_v0 = vld [vmem:[%s5164_s4 + $0x2f4] sm:$0xf0]  ;;  %v3146_v2 = vor.u32 %v3498_v53, %v3145_v51  ;;  %v3126_v52 = vor.u32 %v3491_v57, %v3123_v24 }
 0x162   :  { %1903 = vmatpush.bf16.msrb.mxu2 %v3122_v31  ;;  %1916 = vmatpush.bf16.msrb.mxu3 %v3218_v35  ;;  %v3073_v31 = vld [vmem:[%s5164_s4 + $0x1b0] sm:$0xf]  ;;  %vm407_vm13 = vcmp.gt.f32.partialorder %v4511_v13, 0.0  ;;  %v411_v35 = vmul.f32 0.01, %v4511_v13  ;;  %vm408_vm14 = vcmp.gt.f32.partialorder %v4513_v16, 0.0  ;;  %v2978_v36 = vor.u32 %v3456_v30, %v2977_v25 }
 0x163   :  { %v3074_v37 = vor.u32 %v3480_v32, %v3073_v31  ;;  %vm409_vm15 = vcmp.gt.f32.partialorder %v4525_v29, 0.0  ;;  %v412_v42 = vmul.f32 0.01, %v4513_v16  ;;  %v413_v15 = vmul.f32 0.01, %v4525_v29 }
 0x164   :  { %1878 = vmatpush.bf16.msrb.mxu0 %v2918_v12  ;;  %v3157_v12 = vld [vmem:[%s5164_s4 + $0x258] sm:$0xf]  ;;  %v3470_v56 = vld [vmem:[%s5164_s4 + $0x16c] sm:$0xf]  ;;  %vm410_vm0 = vcmp.gt.f32.partialorder %v390_v48, 0.0  ;;  %v415_v6 = vsel %vm407_vm13, %v4511_v13, %v411_v35 }
 0x165   :  { %1891 = vmatpush.bf16.msrb.mxu1 %v3014_v43  ;;  %v2857_v43 = vld [vmem:[%s5164_s4] sm:$0xf]  ;;  %v3158_v49 = vor.u32 %v3501_v21, %v3157_v12  ;;  %v3042_v4 = vor.u32 %v3470_v56, %v3039_v58  ;;  %v416_v9 = vsel %vm408_vm14, %v4513_v16, %v412_v42  ;;  %v417_v13 = vsel %vm409_vm15, %v4525_v29, %v413_v15  ;;  %v3515_v29 = vld [vmem:[%s5164_s4 + $0x2d4] sm:$0xf]  ;;  %v2919_v35 = vld [vmem:[%s5164_s4 + $0x84] sm:$0xf0] }
 0x166   :  { %1904 = vmatpush.bf16.msrb.mxu2 %v3110_v44  ;;  %1917 = vmatpush.bf16.msrb.mxu3 %v3206_v45  ;;  %v3426_v44 = vld [vmem:[%s5164_s4 + $0x8] sm:$0xf0]  ;;  %v2953_v45 = vld [vmem:[%s5164_s4 + $0xc0] sm:$0xf]  ;;  %v4655_v30 = vpack.c.bf16 %v415_v6, %v415_v6  ;;  %v4657_v31 = vpack.c.bf16 %v416_v9, %v416_v9  ;;  %v4659_v33 = vpack.c.bf16 %v417_v13, %v417_v13  ;;  %v3488_v8 = vld [vmem:[%s5164_s4 + $0x1fc] sm:$0xf] }
 0x167   :  { %v2858_v20 = vor.u32 %v3426_v44, %v2857_v43  ;;  %v2954_v59 = vor.u32 %v3450_v46, %v2953_v45  ;;  %v2931_v17 = vld [vmem:[%s5164_s4 + $0x9c] sm:$0xf0]  ;;  %v3111_v11 = vld [vmem:[%s5164_s4 + $0x204] sm:$0xf0]  ;;  %v3437_v21 = vld [vmem:[%s5164_s4 + $0x64] sm:$0xf] }
 0x168   :  { %1879 = vmatpush.bf16.msrb.mxu0 %v2906_v55  ;;  %v2943_v55 = vld [vmem:[%s5164_s4 + $0xb4] sm:$0xf0]  ;;  %v3027_v16 = vld [vmem:[%s5164_s4 + $0x15c] sm:$0xf0]  ;;  %v3207_v63 = vld [vmem:[%s5164_s4 + $0x2c4] sm:$0xf0]  ;;  %v3114_v12 = vor.u32 %v3488_v8, %v3111_v11 }
 0x169   :  { %1892 = vmatpush.bf16.msrb.mxu1 %v3002_v23  ;;  %v3494_v23 = vld [vmem:[%s5164_s4 + $0x22c] sm:$0xf]  ;;  %v2946_v3 = vor.u32 %v3446_v54, %v2943_v55  ;;  %v2907_v42 = vld [vmem:[%s5164_s4 + $0x6c] sm:$0xf0]  ;;  %v3485_v15 = vld [vmem:[%s5164_s4 + $0x1e4] sm:$0xf] }
 0x16a   :  { %1905 = vmatpush.bf16.msrb.mxu2 %v3098_v27  ;;  %1918 = vmatpush.bf16.msrb.mxu3 %v3194_v1  ;;  %v3135_v27 = vld [vmem:[%s5164_s4 + $0x234] sm:$0xf0]  ;;  %v414_v1 = vmul.f32 0.01, %v390_v48  ;;  %v3003_v44 = vld [vmem:[%s5164_s4 + $0x12c] sm:$0xf0]  ;;  %v2910_v46 = vor.u32 %v3437_v21, %v2907_v42 }
 0x16b   :  { %v3138_v5 = vor.u32 %v3494_v23, %v3135_v27  ;;  %v3195_v45 = vld [vmem:[%s5164_s4 + $0x2ac] sm:$0xf0]  ;;  %v2895_v50 = vld [vmem:[%s5164_s4 + $0x54] sm:$0xf0]  ;;  %v3458_v51 = vld [vmem:[%s5164_s4 + $0x10c] sm:$0xf] }
 0x16c   :  { %1880 = vmatpush.bf16.msrb.mxu0 %v2894_v10  ;;  %v3443_v10 = vld [vmem:[%s5164_s4 + $0x94] sm:$0xf]  ;;  %v418_v25 = vsel %vm410_vm0, %v390_v48, %v414_v1  ;;  %v2991_v54 = vld [vmem:[%s5164_s4 + $0x114] sm:$0xf0]  ;;  %v3482_v55 = vld [vmem:[%s5164_s4 + $0x1cc] sm:$0xf] }
 0x16d   :  { %1893 = vmatpush.bf16.msrb.mxu1 %v2990_v18  ;;  %v3467_v18 = vld [vmem:[%s5164_s4 + $0x154] sm:$0xf]  ;;  %v2934_v32 = vor.u32 %v3443_v10, %v2931_v17  ;;  %v3087_v56 = vld [vmem:[%s5164_s4 + $0x1d4] sm:$0xf0]  ;;  %v2994_v27 = vor.u32 %v3458_v51, %v2991_v54  ;;  %v3171_v6 = vld [vmem:[%s5164_s4 + $0x27c] sm:$0xf0] }
 0x16e   :  { %1906 = vmatpush.bf16.msrb.mxu2 %v3086_v19  ;;  %1919 = vmatpush.bf16.msrb.mxu3 %v3182_v26  ;;  %v3234_v19 = vor.u32 %v3518_v61, %v3231_v0  ;;  %v3219_v26 = vld [vmem:[%s5164_s4 + $0x2dc] sm:$0xf0]  ;;  %v3030_v62 = vor.u32 %v3467_v18, %v3027_v16  ;;  %v3183_v58 = vld [vmem:[%s5164_s4 + $0x294] sm:$0xf0]  ;;  %v3455_v0 = vld [vmem:[%s5164_s4 + $0xf4] sm:$0xf] }
 0x16f   :  { %v3222_v39 = vor.u32 %v3515_v29, %v3219_v26  ;;  %v2883_v61 = vld [vmem:[%s5164_s4 + $0x3c] sm:$0xf0]  ;;  %v3428_v18 = vld [vmem:[%s5164_s4 + $0x1c] sm:$0xf]  ;;  %v2967_v57 = vld [vmem:[%s5164_s4 + $0xe4] sm:$0xf0] }
 0x170   :  { %1881 = vmatpush.bf16.msrb.mxu0 %v2882_v34  ;;  %v3440_v34 = vld [vmem:[%s5164_s4 + $0x7c] sm:$0xf]  ;;  %v3159_v26 = vld [vmem:[%s5164_s4 + $0x264] sm:$0xf0]  ;;  %v3051_v11 = vld [vmem:[%s5164_s4 + $0x18c] sm:$0xf0] }
 0x171   :  { %1894 = vmatpush.bf16.msrb.mxu1 %v2978_v36  ;;  %v3464_v36 = vld [vmem:[%s5164_s4 + $0x13c] sm:$0xf]  ;;  %v2922_v41 = vor.u32 %v3440_v34, %v2919_v35  ;;  %v3033_v51 = vld [vmem:[%s5164_s4 + $0x158] sm:$0xf]  ;;  %v3469_v54 = vld [vmem:[%s5164_s4 + $0x160] sm:$0xf0] }
 0x172   :  { %1907 = vmatpush.bf16.msrb.mxu2 %v3074_v37  ;;  %1920 = vmatpush.bf16.msrb.mxu3 %v3170_v40  ;;  %v4671_v37 = vpack.c.bf16 %v418_v25, %v418_v25  ;;  %v3512_v40 = vld [vmem:[%s5164_s4 + $0x2bc] sm:$0xf]  ;;  %v3018_v22 = vor.u32 %v3464_v36, %v3015_v7  ;;  %v3063_v25 = vld [vmem:[%s5164_s4 + $0x1a4] sm:$0xf0]  ;;  %v3449_v36 = vld [vmem:[%s5164_s4 + $0xc4] sm:$0xf] }
 0x173   :  { %v3210_v43 = vor.u32 %v3512_v40, %v3207_v63  ;;  %v3452_v13 = vld [vmem:[%s5164_s4 + $0xdc] sm:$0xf]  ;;  %v3473_v7 = vld [vmem:[%s5164_s4 + $0x184] sm:$0xf]  ;;  %v3147_v63 = vld [vmem:[%s5164_s4 + $0x24c] sm:$0xf0] }
 0x174   :  { %1882 = vmatpush.bf16.msrb.mxu0 %v2870_v14  ;;  %v3461_v14 = vld [vmem:[%s5164_s4 + $0x124] sm:$0xf]  ;;  %v3476_v24 = vld [vmem:[%s5164_s4 + $0x19c] sm:$0xf]  ;;  %v2970_v34 = vor.u32 %v3452_v13, %v2967_v57  ;;  %v3009_v13 = vld [vmem:[%s5164_s4 + $0x128] sm:$0xf] }
 0x175   :  { %1895 = vmatpush.bf16.msrb.mxu1 %v2966_v28  ;;  %v3099_v28 = vld [vmem:[%s5164_s4 + $0x1ec] sm:$0xf0]  ;;  %v3006_v47 = vor.u32 %v3461_v14, %v3003_v44  ;;  %v3500_v29 = vld [vmem:[%s5164_s4 + $0x25c] sm:$0xf]  ;;  %v3066_v35 = vor.u32 %v3476_v24, %v3063_v25  ;;  %v3497_v40 = vld [vmem:[%s5164_s4 + $0x244] sm:$0xf] }
 0x176   :  { %1908 = vmatpush.bf16.msrb.mxu2 %v3062_v38  ;;  %1921 = vmatpush.bf16.msrb.mxu3 %v3158_v49  ;;  %v3509_v38 = vld [vmem:[%s5164_s4 + $0x2a4] sm:$0xf]  ;;  %v3102_v48 = vor.u32 %v3485_v15, %v3099_v28  ;;  %v3434_v49 = vld [vmem:[%s5164_s4 + $0x4c] sm:$0xf]  ;;  %v3162_v8 = vor.u32 %v3500_v29, %v3159_v26  ;;  %v3472_v42 = vld [vmem:[%s5164_s4 + $0x178] sm:$0xf0]  ;;  %v3054_v15 = vor.u32 %v3473_v7, %v3051_v11 }
 0x177   :  { %v3198_v53 = vor.u32 %v3509_v38, %v3195_v45  ;;  %v2898_v23 = vor.u32 %v3434_v49, %v2895_v50  ;;  %v3141_v14 = vld [vmem:[%s5164_s4 + $0x230] sm:$0xf]  ;;  %v3520_v38 = vld [vmem:[%s5164_s4 + $0x2f8] sm:$0xf0]  ;;  %v3150_v45 = vor.u32 %v3497_v40, %v3147_v63  ;;  %v2937_v49 = vld [vmem:[%s5164_s4 + $0x98] sm:$0xf] }
 0x178   :  { %1883 = vmatpush.bf16.msrb.mxu0 %v2858_v20  ;;  %v3506_v20 = vld [vmem:[%s5164_s4 + $0x28c] sm:$0xf]  ;;  %v3237_v28 = vld [vmem:[%s5164_s4 + $0x2f0] sm:$0xf]  ;;  %v3445_v50 = vld [vmem:[%s5164_s4 + $0xa0] sm:$0xf0] }
 0x179   :  { %1896 = vmatpush.bf16.msrb.mxu1 %v2954_v59  ;;  %v3090_v59 = vor.u32 %v3482_v55, %v3087_v56  ;;  %v3186_v1 = vor.u32 %v3506_v20, %v3183_v58  ;;  %v3129_v55 = vld [vmem:[%s5164_s4 + $0x218] sm:$0xf]  ;;  %v3493_v56 = vld [vmem:[%s5164_s4 + $0x220] sm:$0xf0]  ;;  %v3463_v57 = vld [vmem:[%s5164_s4 + $0x130] sm:$0xf0] }
 0x17a   :  { %1909 = vmatpush.bf16.msrb.mxu2 %v3050_v60  ;;  %1922 = vmatpush.bf16.msrb.mxu3 %v3146_v2  ;;  %v3431_v60 = vld [vmem:[%s5164_s4 + $0x34] sm:$0xf]  ;;  %v2979_v2 = vld [vmem:[%s5164_s4 + $0xfc] sm:$0xf0]  ;;  %v3225_v20 = vld [vmem:[%s5164_s4 + $0x2d8] sm:$0xf] }
 0x17b   :  { %1884 = vmatmul.bf16.vlgmr.msrb.gmra.mxu0 %v4655_v30  ;;  %v2886_v9 = vor.u32 %v3431_v60, %v2883_v61  ;;  %v2982_v10 = vor.u32 %v3455_v0, %v2979_v2  ;;  %v3517_v58 = vld [vmem:[%s5164_s4 + $0x2e0] sm:$0xf0]  ;;  %v2925_v60 = vld [vmem:[%s5164_s4 + $0x80] sm:$0xf]  ;;  %v3442_v61 = vld [vmem:[%s5164_s4 + $0x88] sm:$0xf0] }
 0x17c   :  { %1928 = vmatpush.bf16.msra.mxu0 %v2946_v3  ;;  %1897 = vmatmul.bf16.vlgmr.msrb.gmra.mxu1 %v4657_v31  ;;  %v3479_v3 = vld [vmem:[%s5164_s4 + $0x1b4] sm:$0xf]  ;;  %v3021_v0 = vld [vmem:[%s5164_s4 + $0x140] sm:$0xf]  ;;  %v3466_v2 = vld [vmem:[%s5164_s4 + $0x148] sm:$0xf0] }
 0x17d   :  { %1941 = vmatpush.bf16.msra.mxu1 %v3042_v4  ;;  %1910 = vmatmul.bf16.vlgmr.msrb.gmra.mxu2 %v4659_v33  ;;  %v3075_v4 = vld [vmem:[%s5164_s4 + $0x1bc] sm:$0xf0]  ;;  %v3105_v24 = vld [vmem:[%s5164_s4 + $0x1e8] sm:$0xf]  ;;  %v3487_v25 = vld [vmem:[%s5164_s4 + $0x1f0] sm:$0xf0] }
 0x17e   :  { %1954 = vmatpush.bf16.msra.mxu2 %v3138_v5  ;;  %1967 = vmatpush.bf16.msra.mxu3 %v3234_v19  ;;  %v3503_v5 = vld [vmem:[%s5164_s4 + $0x274] sm:$0xf]  ;;  %v3078_v17 = vor.u32 %v3479_v3, %v3075_v4  ;;  %v2871_v19 = vld [vmem:[%s5164_s4 + $0x24] sm:$0xf0]  ;;  %v3117_v3 = vld [vmem:[%s5164_s4 + $0x200] sm:$0xf] }
 0x17f   :  { %1923 = vmatmul.bf16.vlgmr.msrb.gmra.mxu3 %v4671_v37  ;;  %v3174_v16 = vor.u32 %v3503_v5, %v3171_v6  ;;  %v3490_v4 = vld [vmem:[%s5164_s4 + $0x208] sm:$0xf0]  ;;  %v3213_v5 = vld [vmem:[%s5164_s4 + $0x2c0] sm:$0xf]  ;;  %v3201_v29 = vld [vmem:[%s5164_s4 + $0x2a8] sm:$0xf] }
 0x180   :  { %1929 = vmatpush.bf16.msra.mxu0 %v2934_v32  ;;  %v2874_v32 = vor.u32 %v3428_v18, %v2871_v19  ;;  %v3514_v6 = vld [vmem:[%s5164_s4 + $0x2c8] sm:$0xf0]  ;;  %v2913_v18 = vld [vmem:[%s5164_s4 + $0x68] sm:$0xf]  ;;  %v3439_v19 = vld [vmem:[%s5164_s4 + $0x70] sm:$0xf0] }
 0x181   :  { %1942 = vmatpush.bf16.msra.mxu1 %v3030_v62  ;;  %v3425_v62 = vld [vmem:[%s5164_s4 + $0x4] sm:$0xf]  ;;  %v3511_v26 = vld [vmem:[%s5164_s4 + $0x2b0] sm:$0xf0]  ;;  %v3460_v7 = vld [vmem:[%s5164_s4 + $0x118] sm:$0xf0] }
 0x182   :  { %1955 = vmatpush.bf16.msra.mxu2 %v3126_v52  ;;  %1968 = vmatpush.bf16.msra.mxu3 %v3222_v39  ;;  %v2859_v52 = vld [vmem:[%s5164_s4 + $0xc] sm:$0xf0]  ;;  %v3484_v11 = vld [vmem:[%s5164_s4 + $0x1d8] sm:$0xf0]  ;;  %vm2420_vm0 = vcmask 15360  }
 0x183   :  { %v2955_v39 = vld [vmem:[%s5164_s4 + $0xcc] sm:$0xf0]  ;;  %v2862_v21 = vor.u32 %v3425_v62, %v2859_v52  ;;  %v3010_v62 = vor.u32 %v3463_v57, %v3009_v13  ;;  %v3106_v52 = vor.u32 %v3487_v25, %v3105_v24  ;;  %v3508_v63 = vld [vmem:[%s5164_s4 + $0x298] sm:$0xf0] }
 0x184   :  { %1930 = vmatpush.bf16.msra.mxu0 %v2922_v41  ;;  %v2949_v41 = vld [vmem:[%s5164_s4 + $0xb0] sm:$0xf]  ;;  %v2958_v44 = vor.u32 %v3449_v36, %v2955_v39  ;;  %v3202_v39 = vor.u32 %v3511_v26, %v3201_v29 }
 0x185   :  { %1943 = vmatpush.bf16.msra.mxu1 %v3018_v22  ;;  %v3448_v22 = vld [vmem:[%s5164_s4 + $0xb8] sm:$0xf0]  ;;  %v2997_v36 = vld [vmem:[%s5164_s4 + $0x110] sm:$0xf] }
 0x186   :  { %1956 = vmatpush.bf16.msra.mxu2 %v3114_v12  ;;  %1969 = vmatpush.bf16.msra.mxu3 %v3210_v43  ;;  %v3045_v12 = vld [vmem:[%s5164_s4 + $0x170] sm:$0xf]  ;;  %v3496_v43 = vld [vmem:[%s5164_s4 + $0x238] sm:$0xf0] }
 0x187   :  { %v3189_v40 = vld [vmem:[%s5164_s4 + $0x290] sm:$0xf] }
 0x188   :  { %1931 = vmatpush.bf16.msra.mxu0 %v2910_v46  ;;  %v2950_v46 = vor.u32 %v3448_v22, %v2949_v41  ;;  %v2998_v22 = vor.u32 %v3460_v7, %v2997_v36 }
 0x189   :  { %1944 = vmatpush.bf16.msra.mxu1 %v3006_v47  ;;  %v3046_v47 = vor.u32 %v3472_v42, %v3045_v12  ;;  %v3433_v42 = vld [vmem:[%s5164_s4 + $0x40] sm:$0xf0] }
 0x18a   :  { %1957 = vmatpush.bf16.msra.mxu2 %v3102_v48  ;;  %1970 = vmatpush.bf16.msra.mxu3 %v3198_v53  ;;  %v3142_v48 = vor.u32 %v3496_v43, %v3141_v14  ;;  %v3238_v53 = vor.u32 %v3520_v38, %v3237_v28  ;;  %v2985_v14 = vld [vmem:[%s5164_s4 + $0xf8] sm:$0xf]  ;;  %v3190_v43 = vor.u32 %v3508_v63, %v3189_v40  ;;  %v3481_v28 = vld [vmem:[%s5164_s4 + $0x1c0] sm:$0xf0] }
 0x18b   :  { %v3177_v38 = vld [vmem:[%s5164_s4 + $0x278] sm:$0xf] }
 0x18c   :  { %1932 = vmatpush.bf16.msra.mxu0 %v2898_v23  ;;  %v2938_v23 = vor.u32 %v3445_v50, %v2937_v49  ;;  %v2877_v49 = vld [vmem:[%s5164_s4 + $0x20] sm:$0xf]  ;;  %v3430_v50 = vld [vmem:[%s5164_s4 + $0x28] sm:$0xf0] }
 0x18d   :  { %1945 = vmatpush.bf16.msra.mxu1 %v2994_v27  ;;  %v3034_v27 = vor.u32 %v3469_v54, %v3033_v51  ;;  %v2973_v51 = vld [vmem:[%s5164_s4 + $0xe0] sm:$0xf]  ;;  %v3454_v54 = vld [vmem:[%s5164_s4 + $0xe8] sm:$0xf0] }
 0x18e   :  { %1958 = vmatpush.bf16.msra.mxu2 %v3090_v59  ;;  %1971 = vmatpush.bf16.msra.mxu3 %v3186_v1  ;;  %v3130_v59 = vor.u32 %v3493_v56, %v3129_v55  ;;  %v3226_v1 = vor.u32 %v3517_v58, %v3225_v20  ;;  %v3069_v55 = vld [vmem:[%s5164_s4 + $0x1a0] sm:$0xf]  ;;  %v3478_v56 = vld [vmem:[%s5164_s4 + $0x1a8] sm:$0xf0] }
 0x18f   :  { %v3165_v20 = vld [vmem:[%s5164_s4 + $0x260] sm:$0xf]  ;;  %v3502_v58 = vld [vmem:[%s5164_s4 + $0x268] sm:$0xf0] }
 0x190   :  { %1933 = vmatpush.bf16.msra.mxu0 %v2886_v9  ;;  %v2926_v9 = vor.u32 %v3442_v61, %v2925_v60  ;;  %v2865_v60 = vld [vmem:[%s5164_s4 + $0x8] sm:$0xf]  ;;  %v3427_v61 = vld [vmem:[%s5164_s4 + $0x10] sm:$0xf0] }
 0x191   :  { %1946 = vmatpush.bf16.msra.mxu1 %v2982_v10  ;;  %v3022_v10 = vor.u32 %v3466_v2, %v3021_v0  ;;  %v2961_v0 = vld [vmem:[%s5164_s4 + $0xc8] sm:$0xf]  ;;  %v3451_v2 = vld [vmem:[%s5164_s4 + $0xd0] sm:$0xf0] }
 0x192   :  { %1959 = vmatpush.bf16.msra.mxu2 %v3078_v17  ;;  %1972 = vmatpush.bf16.msra.mxu3 %v3174_v16  ;;  %v3118_v17 = vor.u32 %v3490_v4, %v3117_v3  ;;  %v3214_v16 = vor.u32 %v3514_v6, %v3213_v5  ;;  %v3057_v3 = vld [vmem:[%s5164_s4 + $0x188] sm:$0xf]  ;;  %v3475_v4 = vld [vmem:[%s5164_s4 + $0x190] sm:$0xf0] }
 0x193   :  { %v3153_v5 = vld [vmem:[%s5164_s4 + $0x248] sm:$0xf]  ;;  %v3499_v6 = vld [vmem:[%s5164_s4 + $0x250] sm:$0xf0] }
 0x194   :  { %1934 = vmatpush.bf16.msra.mxu0 %v2874_v32  ;;  %v2914_v32 = vor.u32 %v3439_v19, %v2913_v18  ;;  %v3154_v18 = vor.u32 %v3499_v6, %v3153_v5 }
 0x195   :  { %1947 = vmatpush.bf16.msra.mxu1 %v2970_v34  ;;  %v2901_v34 = vld [vmem:[%s5164_s4 + $0x50] sm:$0xf] }
 0x196   :  { %1960 = vmatpush.bf16.msra.mxu2 %v3066_v35  ;;  %1973 = vmatpush.bf16.msra.mxu3 %v3162_v8  ;;  %v3436_v35 = vld [vmem:[%s5164_s4 + $0x58] sm:$0xf0]  ;;  %v3093_v8 = vld [vmem:[%s5164_s4 + $0x1d0] sm:$0xf] }
 0x197   :  { %v2902_v41 = vor.u32 %v3436_v35, %v2901_v34  ;;  %v3094_v12 = vor.u32 %v3484_v11, %v3093_v8 }
 0x198   :  { %1935 = vmatpush.bf16.msra.mxu0 %v2862_v21  ;;  %v2889_v21 = vld [vmem:[%s5164_s4 + $0x38] sm:$0xf] }
 0x199   :  { %1948 = vmatpush.bf16.msra.mxu1 %v2958_v44  ;;  %v3457_v44 = vld [vmem:[%s5164_s4 + $0x100] sm:$0xf0] }
 0x19a   :  { %1961 = vmatpush.bf16.msra.mxu2 %v3054_v15  ;;  %1974 = vmatpush.bf16.msra.mxu3 %v3150_v45  ;;  %v3081_v15 = vld [vmem:[%s5164_s4 + $0x1b8] sm:$0xf]  ;;  %v3505_v45 = vld [vmem:[%s5164_s4 + $0x280] sm:$0xf0] }
 0x19b   :  { %1936 = vmatmul.bf16.vlgmr.msra.gmra.mxu0 %v4655_v30 }
 0x19c   :  { %1980 = vmatpush.bf16.msrb.mxu0 %v2950_v46  ;;  %1949 = vmatmul.bf16.vlgmr.msra.gmra.mxu1 %v4657_v31  ;;  %v2890_v46 = vor.u32 %v3433_v42, %v2889_v21 }
 0x19d   :  { %1993 = vmatpush.bf16.msrb.mxu1 %v3046_v47  ;;  %1962 = vmatmul.bf16.vlgmr.msra.gmra.mxu2 %v4659_v33  ;;  %v2986_v47 = vor.u32 %v3457_v44, %v2985_v14 }
 0x19e   :  { %2006 = vmatpush.bf16.msrb.mxu2 %v3142_v48  ;;  %2019 = vmatpush.bf16.msrb.mxu3 %v3238_v53  ;;  %v3082_v48 = vor.u32 %v3481_v28, %v3081_v15  ;;  %v3178_v53 = vor.u32 %v3505_v45, %v3177_v38 }
 0x19f   :  { %1975 = vmatmul.bf16.vlgmr.msra.gmra.mxu3 %v4671_v37 }
 0x1a0   :  { %1981 = vmatpush.bf16.msrb.mxu0 %v2938_v23  ;;  %v2878_v23 = vor.u32 %v3430_v50, %v2877_v49 }
 0x1a1   :  { %1994 = vmatpush.bf16.msrb.mxu1 %v3034_v27  ;;  %v2974_v27 = vor.u32 %v3454_v54, %v2973_v51 }
 0x1a2   :  { %2007 = vmatpush.bf16.msrb.mxu2 %v3130_v59  ;;  %2020 = vmatpush.bf16.msrb.mxu3 %v3226_v1  ;;  %v3070_v59 = vor.u32 %v3478_v56, %v3069_v55  ;;  %v3166_v1 = vor.u32 %v3502_v58, %v3165_v20 }
 0x1a4   :  { %1982 = vmatpush.bf16.msrb.mxu0 %v2926_v9  ;;  %v2866_v9 = vor.u32 %v3427_v61, %v2865_v60 }
 0x1a5   :  { %1995 = vmatpush.bf16.msrb.mxu1 %v3022_v10  ;;  %v2962_v10 = vor.u32 %v3451_v2, %v2961_v0 }
 0x1a6   :  { %2008 = vmatpush.bf16.msrb.mxu2 %v3118_v17  ;;  %2021 = vmatpush.bf16.msrb.mxu3 %v3214_v16  ;;  %v3058_v17 = vor.u32 %v3475_v4, %v3057_v3 }
 0x1a8   :  { %1983 = vmatpush.bf16.msrb.mxu0 %v2914_v32 }
 0x1a9   :  { %1996 = vmatpush.bf16.msrb.mxu1 %v3010_v62 }
 0x1aa   :  { %2009 = vmatpush.bf16.msrb.mxu2 %v3106_v52  ;;  %2022 = vmatpush.bf16.msrb.mxu3 %v3202_v39 }
 0x1ac   :  { %1984 = vmatpush.bf16.msrb.mxu0 %v2902_v41 }
 0x1ad   :  { %1997 = vmatpush.bf16.msrb.mxu1 %v2998_v22 }
 0x1ae   :  { %2010 = vmatpush.bf16.msrb.mxu2 %v3094_v12  ;;  %2023 = vmatpush.bf16.msrb.mxu3 %v3190_v43 }
 0x1b0   :  { %1985 = vmatpush.bf16.msrb.mxu0 %v2890_v46 }
 0x1b1   :  { %1998 = vmatpush.bf16.msrb.mxu1 %v2986_v47 }
 0x1b2   :  { %2011 = vmatpush.bf16.msrb.mxu2 %v3082_v48  ;;  %2024 = vmatpush.bf16.msrb.mxu3 %v3178_v53 }
 0x1b4   :  { %1986 = vmatpush.bf16.msrb.mxu0 %v2878_v23 }
 0x1b5   :  { %1999 = vmatpush.bf16.msrb.mxu1 %v2974_v27 }
 0x1b6   :  { %2012 = vmatpush.bf16.msrb.mxu2 %v3070_v59  ;;  %2025 = vmatpush.bf16.msrb.mxu3 %v3166_v1 }
 0x1b8   :  { %1987 = vmatpush.bf16.msrb.mxu0 %v2866_v9  ;;  %v1080_v19 = vpop.f32.mrf.mxu0  ;;  %v1093_v13 = vpop.f32.mrf.mxu1 }
 0x1b9   :  { %2000 = vmatpush.bf16.msrb.mxu1 %v2962_v10 }
 0x1ba   :  { %2013 = vmatpush.bf16.msrb.mxu2 %v3058_v17  ;;  %2026 = vmatpush.bf16.msrb.mxu3 %v3154_v18 }
 0x1bb   :  { %1988 = vmatmul.bf16.vlgmr.msrb.gmra.mxu0 %v4655_v30  ;;  %v551_v30 = vld [vmem:[%s5165_s5] ss:$8 sm:$0x7] }
 0x1bc   :  { %2001 = vmatmul.bf16.vlgmr.msrb.gmra.mxu1 %v4657_v31  ;;  %v555_v7 = vperm.slane %v551_v30, 2 }
 0x1bd   :  { %2014 = vmatmul.bf16.vlgmr.msrb.gmra.mxu2 %v4659_v33  ;;  %2027 = vmatmul.bf16.vlgmr.msrb.gmra.mxu3 %v4671_v37  ;;  %v554_v33 = vperm.slane %v551_v30, 1  ;;  %v553_v37 = vperm.slane %v551_v30, 0 }
 0x1bf   :  { %v1106_v16 = vpop.f32.mrf.mxu2  ;;  %v1081_v8 = vadd.f32 %v1080_v19, %v553_v37 }
 0x1c0   :  { %v1119_v57 = vpop.f32.mrf.mxu3  ;;  %v1082_v24 = vpop.f32.mrf.mxu0 }
 0x1c1   :  { %v1095_v25 = vpop.f32.mrf.mxu1  ;;  %v1094_v12 = vadd.f32 %v1093_v13, %v1081_v8  ;;  %v2854_v13 = vld [vmem:[%s5165_s5 + $0x1] ss:$8 sm:$0x7] }
 0x1c3   :  { %v1107_v42 = vadd.f32 %v1106_v16, %v1094_v12  ;;  %v1359_v16 = vperm.slane %v2854_v13, 1 }
 0x1c5   :  { %v5016_v45 = vadd.f32 %v1119_v57, %v1107_v42  ;;  %v1358_v57 = vperm.slane %v2854_v13, 0 }
 0x1c7   :  { %v1108_v29 = vpop.f32.mrf.mxu2  ;;  %v2042_v56 = vmul.f32 %v5016_v45, %v5016_v45 }
 0x1c8   :  { %v1121_v26 = vpop.f32.mrf.mxu3  ;;  %v1132_v32 = vpop.f32.mrf.mxu0  ;;  %v1360_v29 = vperm.slane %v2854_v13, 2 }
 0x1c9   :  { %v1145_v62 = vpop.f32.mrf.mxu1  ;;  %v1133_v36 = vadd.f32 %v1132_v32, %v554_v33 }
 0x1cb   :  { %v1146_v63 = vadd.f32 %v1145_v62, %v1133_v36 }
 0x1cf   :  { %v1158_v52 = vpop.f32.mrf.mxu2 }
 0x1d0   :  { %v1171_v34 = vpop.f32.mrf.mxu3  ;;  %v1134_v35 = vpop.f32.mrf.mxu0  ;;  %v1159_v21 = vadd.f32 %v1158_v52, %v1146_v63 }
 0x1d1   :  { %v1147_v31 = vpop.f32.mrf.mxu1 }
 0x1d2   :  { %v5014_v43 = vadd.f32 %v1171_v34, %v1159_v21 }
 0x1d4   :  { %v2036_v48 = vadd.f32 %v5014_v43, %v5016_v45  ;;  %v2043_v53 = vmul.f32 %v5014_v43, %v5014_v43 }
 0x1d6   :  { %v2045_v58 = vadd.f32 %v2043_v53, %v2042_v56  ;;  %v3534_v53 = vld [vmem:[%s5166_s6 + $0x68] sm:$0xff]  ;;  %v3533_v56 = vld [vmem:[%s5166_s6 + $0x60] sm:$0xff] }
 0x1d7   :  { %v1160_v39 = vpop.f32.mrf.mxu2 }
 0x1d8   :  { %v1173_v11 = vpop.f32.mrf.mxu3  ;;  %v1184_v40 = vpop.f32.mrf.mxu0 }
 0x1d9   :  { %v1197_v41 = vpop.f32.mrf.mxu1  ;;  %v1185_v22 = vadd.f32 %v1184_v40, %v555_v7 }
 0x1db   :  { %v1198_v14 = vadd.f32 %v1197_v41, %v1185_v22 }
 0x1e0   :  { %v1210_v44 = vpop.f32.mrf.mxu2  ;;  %v1186_v38 = vpop.f32.mrf.mxu0 }
 0x1e1   :  { %v1211_v15 = vadd.f32 %v1210_v44, %v1198_v14  ;;  %v1199_v46 = vpop.f32.mrf.mxu1 }
 0x1e2   :  { %v1223_v28 = vpop.f32.mrf.mxu3  ;;  %v3528_v46 = vld [vmem:[%s5166_s6 + $0x38] sm:$0xff] }
 0x1e3   :  { %v5018_v47 = vadd.f32 %v1223_v28, %v1211_v15  ;;  %2333 = vmatpush.bf16.msra.mxu0 %v3528_v46  ;;  %2375 = vmatpush.bf16.msra.mxu3 %v3528_v46 }
 0x1e5   :  { %v2038_v49 = vsel %vm2037_vm1, %v5018_v47, 0.0  ;;  %v2044_v51 = vmul.f32 %v5018_v47, %v5018_v47 }
 0x1e6   :  { %v2039_v50 = vadd.f32 %v2038_v49, %v2036_v48  ;;  %v3536_v48 = vld [vmem:[%s5166_s6 + $0x78] sm:$0xff]  ;;  %v3527_v49 = vld [vmem:[%s5166_s6 + $0x30] sm:$0xff] }
 0x1e7   :  { %v2046_v20 = vsel %vm2037_vm1, %v2044_v51, 0.0  ;;  %2346 = vmatpush.bf16.msra.mxu1 %v3536_v48  ;;  %2334 = vmatpush.bf16.msra.mxu0 %v3527_v49  ;;  %v3526_v51 = vld [vmem:[%s5166_s6 + $0x28] sm:$0xff] }
 0x1e8   :  { %v1212_v54 = vpop.f32.mrf.mxu2  ;;  %2040 = vadd.xlane.f32.xlu2 %v2039_v50  ;;  %v2047_v23 = vadd.f32 %v2046_v20, %v2045_v58  ;;  %v3535_v50 = vld [vmem:[%s5166_s6 + $0x70] sm:$0xff]  ;;  %2376 = vmatpush.bf16.msra.mxu3 %v3527_v49  ;;  %v3524_v20 = vld [vmem:[%s5166_s6 + $0x18] sm:$0xff] }
 0x1e9   :  { %v5081_v58 = vld [vmem:[%s5166_s6 + $0x58] sm:$0xff] }
 0x1ea   :  { %v1225_v55 = vpop.f32.mrf.mxu3 }
 0x1eb   :  { %2347 = vmatpush.bf16.msra.mxu1 %v3535_v50  ;;  %2335 = vmatpush.bf16.msra.mxu0 %v3526_v51  ;;  %v3525_v55 = vld [vmem:[%s5166_s6 + $0x20] sm:$0xff] }
 0x1ec   :  { %2377 = vmatpush.bf16.msra.mxu3 %v3526_v51 }
 0x1ef   :  { %2348 = vmatpush.bf16.msra.mxu1 %v3534_v53  ;;  %2336 = vmatpush.bf16.msra.mxu0 %v3525_v55 }
 0x1f0   :  { %2048 = vadd.xlane.f32.xlu2 %v2047_v23  ;;  %2378 = vmatpush.bf16.msra.mxu3 %v3525_v55 }
 0x1f3   :  { %2349 = vmatpush.bf16.msra.mxu1 %v3533_v56  ;;  %2337 = vmatpush.bf16.msra.mxu0 %v3524_v20 }
 0x1f4   :  { %2379 = vmatpush.bf16.msra.mxu3 %v3524_v20 }
 0x1f7   :  { %2350 = vmatpush.bf16.msra.mxu1 %v5081_v58 }
 0x1f8   :  { %v1885_v27 = vpop.f32.mrf.mxu0 }
 0x1f9   :  { %v1898_v59 = vpop.f32.mrf.mxu1  ;;  %v1886_v25 = vadd.f32 %v1885_v27, %v1358_v57  ;;  %v3317_v27 = vld [vmem:[%s5166_s6 + $0x90] sm:$0xf] }
 0x1fb   :  { %v1899_v62 = vadd.f32 %v1898_v59, %v1886_v25  ;;  %v3523_v59 = vld [vmem:[%s5166_s6 + $0x10] sm:$0xff] }
 0x1fc   :  { %2338 = vmatpush.bf16.msra.mxu0 %v3523_v59  ;;  %2380 = vmatpush.bf16.msra.mxu3 %v3523_v59 }
 0x200   :  { %v1911_v60 = vpop.f32.mrf.mxu2  ;;  %v1887_v0 = vpop.f32.mrf.mxu0 }
 0x201   :  { %v1900_v1 = vpop.f32.mrf.mxu1  ;;  %v1912_v30 = vadd.f32 %v1911_v60, %v1899_v62  ;;  %v5095_v60 = vld [vmem:[%s5166_s6 + $0x50] sm:$0xff] }
 0x202   :  { %v1924_v61 = vpop.f32.mrf.mxu3  ;;  %2351 = vmatpush.bf16.msra.mxu1 %v5095_v60  ;;  %v3240_v62 = vld [vmem:[%s5165_s5 + $0x4] ss:$8 sm:$0x7] }
 0x203   :  { %v5036_v37 = vadd.f32 %v1924_v61, %v1912_v30  ;;  %v3539_v61 = vld [vmem:[%s5166_s6 + $0x90] sm:$0x30] }
 0x204   :  { %v3318_v0 = vor.u32 %v3539_v61, %v3317_v27 }
 0x205   :  { %v2101_v41 = vmul.f32 %v5036_v37, %v5036_v37 }
 0x208   :  { %v1913_v2 = vpop.f32.mrf.mxu2 }
 0x20a   :  { %v1926_v3 = vpop.f32.mrf.mxu3 }
 0x218   :  { %v1937_v4 = vpop.f32.mrf.mxu0 }
 0x219   :  { %v1950_v5 = vpop.f32.mrf.mxu1  ;;  %v1938_v24 = vadd.f32 %v1937_v4, %v1359_v16  ;;  %v2331_v4 = vsel %vm2329_vm2, %v3318_v0, 0  ;;  %v3537_v16 = vld [vmem:[%s5166_s6 + $0x80] sm:$0xff] }
 0x21a   :  { %2364 = vmatpush.bf16.msra.mxu2 %v2331_v4 }
 0x21b   :  { %v1951_v26 = vadd.f32 %v1950_v5, %v1938_v24  ;;  %v3522_v5 = vld [vmem:[%s5166_s6 + $0x8] sm:$0xff] }
 0x21c   :  { %2339 = vmatpush.bf16.msra.mxu0 %v3522_v5  ;;  %2381 = vmatpush.bf16.msra.mxu3 %v3522_v5 }
 0x220   :  { %v1963_v6 = vpop.f32.mrf.mxu2  ;;  %v1939_v10 = vpop.f32.mrf.mxu0 }
 0x221   :  { %v1952_v17 = vpop.f32.mrf.mxu1  ;;  %v1964_v52 = vadd.f32 %v1963_v6, %v1951_v26  ;;  %v5109_v6 = vld [vmem:[%s5166_s6 + $0x48] sm:$0xff] }
 0x222   :  { %v1976_v9 = vpop.f32.mrf.mxu3  ;;  %v3538_v10 = vld [vmem:[%s5166_s6 + $0x88] sm:$0xff]  ;;  %2352 = vmatpush.bf16.msra.mxu1 %v5109_v6 }
 0x223   :  { %v5034_v31 = vadd.f32 %v1976_v9, %v1964_v52  ;;  %2365 = vmatpush.bf16.msra.mxu2 %v3538_v10  ;;  %v3239_v26 = vld [vmem:[%s5165_s5 + $0x2] ss:$8 sm:$0x7] }
 0x225   :  { %v2102_v11 = vmul.f32 %v5034_v31, %v5034_v31  ;;  %v2096_v22 = vadd.f32 %v5034_v31, %v5036_v37 }
 0x227   :  { %v2104_v14 = vadd.f32 %v2102_v11, %v2101_v41  ;;  %2366 = vmatpush.bf16.msra.mxu2 %v3537_v16  ;;  %v2084_v11 = vperm.slane %v3240_v62, 1 }
 0x228   :  { %v1965_v18 = vpop.f32.mrf.mxu2 }
 0x229   :  { %v3521_v18 = vld [vmem:[%s5166_s6] sm:$0xff] }
 0x22a   :  { %v1978_v19 = vpop.f32.mrf.mxu3  ;;  %2340 = vmatpush.bf16.msra.mxu0 %v3521_v18  ;;  %2382 = vmatpush.bf16.msra.mxu3 %v3521_v18 }
 0x22b   :  { %v5121_v19 = vld [vmem:[%s5166_s6 + $0x40] sm:$0xff]  ;;  %2388 = vmatpush.bf16.msrb.mxu2 %v3536_v48 }
 0x22c   :  { %2353 = vmatpush.bf16.msra.mxu1 %v5121_v19 }
 0x22e   :  { %2406 = vmatpush.bf16.msrb.mxu0 %v2331_v4 }
 0x22f   :  { %2389 = vmatpush.bf16.msrb.mxu2 %v3535_v50 }
 0x232   :  { %2407 = vmatpush.bf16.msrb.mxu0 %v3538_v10 }
 0x233   :  { %2390 = vmatpush.bf16.msrb.mxu2 %v3534_v53 }
 0x236   :  { %2408 = vmatpush.bf16.msrb.mxu0 %v3537_v16 }
 0x237   :  { %2391 = vmatpush.bf16.msrb.mxu2 %v3533_v56 }
 0x238   :  { %v1989_v32 = vpop.f32.mrf.mxu0 }
 0x239   :  { %v2002_v34 = vpop.f32.mrf.mxu1  ;;  %v1990_v35 = vadd.f32 %v1989_v32, %v1360_v29 }
 0x23b   :  { %v2003_v33 = vadd.f32 %v2002_v34, %v1990_v35  ;;  %v2075_v34 = vperm.slane %v3239_v26, 2  ;;  %2392 = vmatpush.bf16.msrb.mxu2 %v5081_v58 }
 0x23f   :  { %2393 = vmatpush.bf16.msrb.mxu2 %v5095_v60 }
 0x240   :  { %v2015_v36 = vpop.f32.mrf.mxu2  ;;  %v2028_v7 = vpop.f32.mrf.mxu3 }
 0x241   :  { %v2016_v39 = vadd.f32 %v2015_v36, %v2003_v33  ;;  %v1991_v8 = vpop.f32.mrf.mxu0  ;;  %v2004_v40 = vpop.f32.mrf.mxu1  ;;  %v2073_v36 = vperm.slane %v3239_v26, 0 }
 0x242   :  { %v2083_v8 = vperm.slane %v3240_v62, 0 }
 0x243   :  { %v5040_v63 = vadd.f32 %v2028_v7, %v2016_v39  ;;  %v2074_v39 = vperm.slane %v3239_v26, 1  ;;  %2394 = vmatpush.bf16.msrb.mxu2 %v5109_v6 }
 0x245   :  { %v2097_v12 = vsel %vm2037_vm1, %v5040_v63, 0.0  ;;  %v2103_v21 = vmul.f32 %v5040_v63, %v5040_v63 }
 0x246   :  { %v2098_v42 = vadd.f32 %v2097_v12, %v2096_v22 }
 0x247   :  { %v2105_v44 = vsel %vm2037_vm1, %v2103_v21, 0.0  ;;  %2395 = vmatpush.bf16.msrb.mxu2 %v5121_v19 }
 0x248   :  { %v2017_v15 = vpop.f32.mrf.mxu2  ;;  %2099 = vadd.xlane.f32.xlu0 %v2098_v42  ;;  %v2106_v28 = vadd.f32 %v2105_v44, %v2104_v14  ;;  %v2030_v38 = vpop.f32.mrf.mxu3 }
 0x24a   :  { %2107 = vadd.xlane.f32.xlu1 %v2106_v28 }
 0x25b   :  { %v2041_v54 = vpop.xlane.xlu2 %2040 }
 0x25c   :  { %v5083_v23 = vmul.f32 0.0033333334, %v2041_v54 }
 0x25e   :  { %v2052_v2 = vmul.f32 %v5083_v23, %v5083_v23  ;;  %v2066_v52 = vsub.f32 %v5016_v45, %v5083_v23  ;;  %v2067_v30 = vsub.f32 %v5014_v43, %v5083_v23  ;;  %v2068_v33 = vsub.f32 %v5018_v47, %v5083_v23 }
 0x25f   :  { %v2085_v45 = vperm.slane %v3240_v62, 2 }
 0x263   :  { %v2049_v1 = vpop.xlane.xlu2 %2048 }
 0x264   :  { %v2051_v3 = vmul.f32 0.0033333334, %v2049_v1  ;;  %v3241_v1 = vld [vmem:[%s5165_s5 + $0x3] ss:$8 sm:$0x7] }
 0x265   :  { %v2134_v4 = vperm.slane %v3241_v1, 2  ;;  %v2132_v6 = vperm.slane %v3241_v1, 0  ;;  %v2133_v18 = vperm.slane %v3241_v1, 1 }
 0x266   :  { %v2053_v9 = vsub.f32 %v2051_v3, %v2052_v2  ;;  %v3242_v3 = vld [vmem:[%s5165_s5 + $0x5] ss:$8 sm:$0x7] }
 0x267   :  { %v2143_v16 = vperm.slane %v3242_v3, 1 }
 0x268   :  { %v2054_v17 = vmax.f32 %v2053_v9, 0.0 }
 0x26a   :  { %v2055_v13 = vadd.f32 1e-05, %v2054_v17 }
 0x26c   :  { %3545 = vrsqrt.f32 %v2055_v13  ;;  %vm2062_vm4 = vweird.f32 %v2055_v13 }
 0x272   :  { %v3546_v57 = vpop.eup %3545 }
 0x273   :  { %v2057_v24 = vmul.f32 %v3546_v57, %v2055_v13  ;;  %vm2063_vm3 = vweird.f32 %v3546_v57  ;;  %v2142_v13 = vperm.slane %v3242_v3, 0 }
 0x274   :  { %vm2064_vm5 = vmor %vm2062_vm4, %vm2063_vm3 }
 0x275   :  { %v2058_v25 = vmul.f32 %v3546_v57, %v2057_v24 }
 0x277   :  { %v2059_v29 = vmul.f32 0.5, %v2058_v25 }
 0x279   :  { %v2060_v32 = vsub.f32 1.5, %v2059_v29  ;;  %v2144_v29 = vperm.slane %v3242_v3, 2 }
 0x27b   :  { %v2061_v35 = vmul.f32 %v3546_v57, %v2060_v32 }
 0x27d   :  { %v2065_v7 = vsel %vm2064_vm5, %v3546_v57, %v2061_v35 }
 0x27e   :  { %v2069_v40 = vmul.f32 %v2066_v52, %v2065_v7  ;;  %v2070_v41 = vmul.f32 %v2067_v30, %v2065_v7  ;;  %v2071_v22 = vmul.f32 %v2068_v33, %v2065_v7 }
 0x280   :  { %v2081_v12 = vmul.f32 %v2075_v34, %v2071_v22  ;;  %v2079_v21 = vmul.f32 %v2073_v36, %v2069_v40  ;;  %v2080_v42 = vmul.f32 %v2074_v39, %v2070_v41 }
 0x282   :  { %v2089_v14 = vadd.f32 %v2083_v8, %v2079_v21  ;;  %v2090_v43 = vadd.f32 %v2084_v11, %v2080_v42  ;;  %v2091_v44 = vadd.f32 %v2085_v45, %v2081_v12 }
 0x284   :  { %vm2151_vm6 = vcmp.gt.f32.partialorder %v2089_v14, 0.0  ;;  %v2154_v47 = vmul.f32 0.01, %v2089_v14  ;;  %vm2152_vm7 = vcmp.gt.f32.partialorder %v2090_v43, 0.0  ;;  %v2155_v15 = vmul.f32 0.01, %v2090_v43 }
 0x285   :  { %vm2153_vm8 = vcmp.gt.f32.partialorder %v2091_v44, 0.0  ;;  %v2156_v28 = vmul.f32 0.01, %v2091_v44 }
 0x286   :  { %v2157_v38 = vsel %vm2151_vm6, %v2089_v14, %v2154_v47  ;;  %v2158_v46 = vsel %vm2152_vm7, %v2090_v43, %v2155_v15  ;;  %v2415_v14 = vlaneseq }
 0x287   :  { %v2160_v48 = vpack.c.bf16 %v2157_v38, %v2157_v38  ;;  %v2161_v49 = vpack.c.bf16 %v2158_v46, %v2158_v46  ;;  %v2159_v50 = vsel %vm2153_vm8, %v2091_v44, %v2156_v28  ;;  %v2414_v46 = vld [vmem:[%s5165_s5 + $0x6] ss:$0 sm:$0xff] }
 0x288   :  { %v2162_v51 = vpack.c.bf16 %v2159_v50, %v2159_v50  ;;  %v2416_v44 = vand.u32 127, %v2415_v14 }
 0x289   :  { %2341 = vmatmul.bf16.vlgmr.msra.gmra.mxu0 %v2160_v48  ;;  %2354 = vmatmul.bf16.vlgmr.msra.gmra.mxu1 %v2161_v49 }
 0x28a   :  { %3319 = vmatmul.msk.bf16.vlgmr.msra.gmra.mxu2 %vm2037_vm1, %v2162_v51  ;;  %vm2417_vm15 = vcmp.eq.s32.totalorder %v2416_v44, 0 }
 0x2bb   :  { %v2100_v53 = vpop.xlane.xlu0 %2099 }
 0x2bc   :  { %v2109_v54 = vmul.f32 0.0033333334, %v2100_v53 }
 0x2bd   :  { %v2108_v55 = vpop.xlane.xlu1 %2107 }
 0x2be   :  { %v2110_v56 = vmul.f32 0.0033333334, %v2108_v55  ;;  %v2111_v20 = vmul.f32 %v2109_v54, %v2109_v54  ;;  %v2125_v9 = vsub.f32 %v5036_v37, %v2109_v54  ;;  %v2126_v10 = vsub.f32 %v5034_v31, %v2109_v54 }
 0x2bf   :  { %v2127_v17 = vsub.f32 %v5040_v63, %v2109_v54 }
 0x2c0   :  { %v2112_v58 = vsub.f32 %v2110_v56, %v2111_v20 }
 0x2c2   :  { %v2113_v23 = vmax.f32 %v2112_v58, 0.0 }
 0x2c4   :  { %v2114_v27 = vadd.f32 1e-05, %v2113_v23 }
 0x2c6   :  { %3547 = vrsqrt.f32 %v2114_v27  ;;  %vm2121_vm10 = vweird.f32 %v2114_v27 }
 0x2cc   :  { %v3548_v59 = vpop.eup %3547 }
 0x2cd   :  { %v2116_v60 = vmul.f32 %v3548_v59, %v2114_v27  ;;  %vm2122_vm9 = vweird.f32 %v3548_v59 }
 0x2ce   :  { %vm2123_vm11 = vmor %vm2121_vm10, %vm2122_vm9 }
 0x2cf   :  { %v2117_v61 = vmul.f32 %v3548_v59, %v2116_v60 }
 0x2d1   :  { %v2118_v0 = vmul.f32 0.5, %v2117_v61 }
 0x2d3   :  { %v2119_v2 = vsub.f32 1.5, %v2118_v0 }
 0x2d5   :  { %v2120_v5 = vmul.f32 %v3548_v59, %v2119_v2 }
 0x2d7   :  { %v2124_v19 = vsel %vm2123_vm11, %v3548_v59, %v2120_v5 }
 0x2d8   :  { %v2128_v57 = vmul.f32 %v2125_v9, %v2124_v19  ;;  %v2129_v24 = vmul.f32 %v2126_v10, %v2124_v19  ;;  %v2130_v25 = vmul.f32 %v2127_v17, %v2124_v19 }
 0x2da   :  { %v2140_v26 = vmul.f32 %v2134_v4, %v2130_v25  ;;  %v2138_v32 = vmul.f32 %v2132_v6, %v2128_v57  ;;  %v2139_v62 = vmul.f32 %v2133_v18, %v2129_v24 }
 0x2dc   :  { %v2148_v52 = vadd.f32 %v2142_v13, %v2138_v32  ;;  %v2149_v34 = vadd.f32 %v2143_v16, %v2139_v62  ;;  %v2150_v35 = vadd.f32 %v2144_v29, %v2140_v26 }
 0x2de   :  { %vm2163_vm12 = vcmp.gt.f32.partialorder %v2148_v52, 0.0  ;;  %v2166_v37 = vmul.f32 0.01, %v2148_v52  ;;  %vm2164_vm13 = vcmp.gt.f32.partialorder %v2149_v34, 0.0  ;;  %v2167_v31 = vmul.f32 0.01, %v2149_v34 }
 0x2df   :  { %vm2165_vm14 = vcmp.gt.f32.partialorder %v2150_v35, 0.0  ;;  %v2168_v63 = vmul.f32 0.01, %v2150_v35 }
 0x2e0   :  { %v2169_v30 = vsel %vm2163_vm12, %v2148_v52, %v2166_v37  ;;  %v2170_v33 = vsel %vm2164_vm13, %v2149_v34, %v2167_v31 }
 0x2e1   :  { %v2172_v36 = vpack.c.bf16 %v2169_v30, %v2169_v30  ;;  %v2173_v39 = vpack.c.bf16 %v2170_v33, %v2170_v33  ;;  %v2171_v7 = vsel %vm2165_vm14, %v2150_v35, %v2168_v63 }
 0x2e2   :  { %v2174_v8 = vpack.c.bf16 %v2171_v7, %v2171_v7 }
 0x2e3   :  { %2383 = vmatmul.bf16.vlgmr.msra.gmra.mxu3 %v2172_v36  ;;  %2396 = vmatmul.bf16.vlgmr.msrb.gmra.mxu2 %v2173_v39 }
 0x2e4   :  { %3320 = vmatmul.msk.bf16.vlgmr.msrb.gmra.mxu0 %vm2037_vm1, %v2174_v8 }
 0x306   :  { %v2342_v11 = vpop.f32.mrf.mxu0  ;;  %v2355_v40 = vpop.f32.mrf.mxu1 }
 0x307   :  { %v2356_v41 = vadd.f32 %v2355_v40, %v2342_v11 }
 0x30d   :  { %v2368_v22 = vpop.f32.mrf.mxu2 }
 0x30e   :  { %v2369_v45 = vadd.f32 %v2368_v22, %v2356_v41  ;;  %v2344_v12 = vpop.f32.mrf.mxu0  ;;  %v2357_v21 = vpop.f32.mrf.mxu1 }
 0x315   :  { %v2370_v42 = vpop.f32.mrf.mxu2 }
 0x361   :  { %v2410_v43 = vpop.f32.mrf.mxu0 }
 0x366   :  { %v2384_v47 = vpop.f32.mrf.mxu3  ;;  %v2397_v15 = vpop.f32.mrf.mxu2 }
 0x367   :  { %v2398_v28 = vadd.f32 %v2397_v15, %v2384_v47 }
 0x369   :  { %v2411_v38 = vadd.f32 %v2410_v43, %v2398_v28  ;;  %v2412_v48 = vpop.f32.mrf.mxu0 }
 0x36b   :  { %v2418_v49 = vsel %vm2417_vm15, %v2369_v45, %v2411_v38 }
 0x36c   :  { %v2419_v50 = vadd.f32 %v2418_v49, %v2414_v46 }
 0x36e   :  { %2421 = vst.msk [vmem:[%s5167_s7] sm:$0xff] %vm2420_vm0, %v2419_v50  ;;  %v2386_v51 = vpop.f32.mrf.mxu3  ;;  %v2399_v53 = vpop.f32.mrf.mxu2 }

</bundles_post_ra>
